<compile_context>
chip_gen: v6e
topology: v6e:2x2x1
jax: 0.10.0
libtpu: 0.0.40
codegen_flags: <defaults>
</compile_context>

<pallas_src>
import jax
import jax.numpy as jnp
from jax.experimental import pallas as pl
from jax.experimental.pallas import tpu as pltpu

IN_DIM = 784
HID_DIM = 500
OUT_DIM = 10
HID_PAD = 512     # 500 -> 512 (4 x 128 lanes)
OUT_PAD = 128     # 10  -> 128 (1 full lane group, unmasked stores)
DROP_P = 0.5      # inverted dropout: keep w.p. 0.5, scale kept by 2.0


def _keep_mask(seed_i32, tile_rows, shape):
    """Bernoulli(0.5) keep-mask from a counter-based uint32 hash.

    `shape` = (TB, HID_PAD); rows are offset by the global row index of this
    batch tile so different grid steps get independent masks.
    """
    tb, hd = shape
    rows = jax.lax.broadcasted_iota(jnp.int32, shape, 0) + tile_rows
    cols = jax.lax.broadcasted_iota(jnp.int32, shape, 1)
    z = rows.astype(jnp.uint32) * jnp.uint32(0x9E3779B1)
    z = z ^ (cols.astype(jnp.uint32) * jnp.uint32(0x85EBCA77))
    z = z + seed_i32.astype(jnp.uint32)
    # murmur3-style finalizer -> well-mixed bits
    z = z ^ (z >> 16)
    z = z * jnp.uint32(0x7FEB352D)
    z = z ^ (z >> 15)
    z = z * jnp.uint32(0x846CA68B)
    z = z ^ (z >> 16)
    return (z & jnp.uint32(1)) != 0


def dropout_net_kernel(seed_ref, x_ref, w1_ref, b1_ref, w2_ref, b2_ref, o_ref):
    tb = x_ref.shape[0]

    # fc1 + bias + ReLU (MXU matmul, f32 accumulate; VPU elementwise)
    h = jnp.dot(x_ref[...], w1_ref[...], preferred_element_type=jnp.float32)
    h = jnp.maximum(h + b1_ref[...], 0.0)

    # Dropout(p=0.5), training mode, inverted scaling. Counter-based hash RNG
    # keyed on (seed, global row, hidden col) -> deterministic & tile-safe.
    # TODO(synk): on real hardware pltpu.prng_seed/prng_random_bits could
    # replace the hash (cheaper VPU-wise) once interpret-mode parity matters less.
    keep = _keep_mask(seed_ref[0], pl.program_id(0) * tb, h.shape)
    h = jnp.where(keep, h * (1.0 / (1.0 - DROP_P)), 0.0)

    # fc2 + bias (lane-dense 128-wide output -> unmasked stores)
    y = jnp.dot(h, w2_ref[...], preferred_element_type=jnp.float32)
    o_ref[...] = (y + b2_ref[...]).astype(o_ref.dtype)


def dropout_net(x, w1, b1, w2, b2, seed, *, block_b=512):
    """x: (B, 1, 28, 28) or (B, 784); w1/b1/w2/b2 laid out like nn.Linear."""
    B = x.shape[0]
    x2d = x.reshape(B, -1).astype(jnp.float32)

    # Pre-transpose weights to (in, out) and zero-pad to lane-aligned widths.
    w1t = jnp.zeros((IN_DIM, HID_PAD), jnp.float32).at[:, :HID_DIM].set(
        w1.T.astype(jnp.float32))
    b1r = jnp.zeros((1, HID_PAD), jnp.float32).at[:, :HID_DIM].set(
        b1.astype(jnp.float32))
    w2t = jnp.zeros((HID_PAD, OUT_PAD), jnp.float32).at[:HID_DIM, :OUT_DIM].set(
        w2.T.astype(jnp.float32))
    b2r = jnp.zeros((1, OUT_PAD), jnp.float32).at[:, :OUT_DIM].set(
        b2.astype(jnp.float32))

    # Batch tile: multiple of 8 sublanes, capped at block_b; pad B to a
    # multiple of the tile so every grid step sees a full block.
    tb = min(block_b, ((B + 7) // 8) * 8)
    bp = pl.cdiv(B, tb) * tb
    if bp != B:
        x2d = jnp.pad(x2d, ((0, bp - B), (0, 0)))

    seed_arr = jnp.asarray([seed], dtype=jnp.int32)

    grid_spec = pltpu.PrefetchScalarGridSpec(
        num_scalar_prefetch=1,
        grid=(bp // tb,),
        in_specs=[
            pl.BlockSpec((tb, IN_DIM), lambda i, seed: (i, 0)),       # x tile
            pl.BlockSpec((IN_DIM, HID_PAD), lambda i, seed: (0, 0)),  # W1 (resident)
            pl.BlockSpec((1, HID_PAD), lambda i, seed: (0, 0)),       # b1
            pl.BlockSpec((HID_PAD, OUT_PAD), lambda i, seed: (0, 0)), # W2 (resident)
            pl.BlockSpec((1, OUT_PAD), lambda i, seed: (0, 0)),       # b2
        ],
        out_specs=pl.BlockSpec((tb, OUT_PAD), lambda i, seed: (i, 0)),
    )

    out_padded = pl.pallas_call(
        dropout_net_kernel,
        out_shape=jax.ShapeDtypeStruct((bp, OUT_PAD), jnp.float32),
        grid_spec=grid_spec,
        compiler_params=pltpu.CompilerParams(
            dimension_semantics=("parallel",),     # batch tiles -> 2 TCs on v7x
            vmem_limit_bytes=32 * 1024 * 1024,
        ),
    )(seed_arr, x2d, w1t, b1r, w2t, b2r)

    return out_padded[:B, :OUT_DIM]


def init_params(key):
    # Deterministic init mimicking nn.Linear's U(-1/sqrt(fan_in), 1/sqrt(fan_in)).
    k1, k2, k3, k4 = jax.random.split(key, 4)
    lim1 = 1.0 / jnp.sqrt(IN_DIM)
    lim2 = 1.0 / jnp.sqrt(HID_DIM)
    w1 = jax.random.uniform(k1, (HID_DIM, IN_DIM), jnp.float32, -lim1, lim1)
    b1 = jax.random.uniform(k2, (HID_DIM,), jnp.float32, -lim1, lim1)
    w2 = jax.random.uniform(k3, (OUT_DIM, HID_DIM), jnp.float32, -lim2, lim2)
    b2 = jax.random.uniform(k4, (OUT_DIM,), jnp.float32, -lim2, lim2)
    return w1, b1, w2, b2


if __name__ == "__main__":
    key = jax.random.PRNGKey(0)
    kx, kp = jax.random.split(key)
    batch = 2
    x = jax.random.normal(kx, (batch, 1, 28, 28), dtype=jnp.float32)  # -> (2, 784)
    w1, b1, w2, b2 = init_params(kp)

    out = dropout_net(x, w1, b1, w2, b2, seed=1234)
    out = jax.block_until_ready(out)
    assert out.shape == (batch, OUT_DIM), out.shape
    assert bool(jnp.all(jnp.isfinite(out)))
    print("KERNEL_OK")
</pallas_src>

<mosaic_0001>
module attributes {stable_mosaic.version = 11 : i64} {
  func.func @dropout_net_kernel(%arg0: i32, %arg1: memref<1xi32, #tpu.memory_space<smem>>, %arg2: memref<8x784xf32, #tpu.memory_space<vmem>>, %arg3: memref<784x512xf32, #tpu.memory_space<vmem>>, %arg4: memref<1x512xf32, #tpu.memory_space<vmem>>, %arg5: memref<512x128xf32, #tpu.memory_space<vmem>>, %arg6: memref<1x128xf32, #tpu.memory_space<vmem>>, %arg7: memref<8x128xf32, #tpu.memory_space<vmem>>) attributes {dimension_semantics = [#tpu.dimension_semantics<parallel>], iteration_bounds = array<i64: 1>, scalar_prefetch = 1 : i64, scratch_operands = 0 : i64, tpu.core_type = #tpu.core_type<tc>, window_params = [{transform_indices = @transform_0, window_bounds = array<i64: 8, 784>}, {pipeline_mode = #tpu.pipeline_mode<synchronous>, transform_indices = @transform_1, window_bounds = array<i64: 784, 512>}, {pipeline_mode = #tpu.pipeline_mode<synchronous>, transform_indices = @transform_2, window_bounds = array<i64: 1, 512>}, {pipeline_mode = #tpu.pipeline_mode<synchronous>, transform_indices = @transform_3, window_bounds = array<i64: 512, 128>}, {pipeline_mode = #tpu.pipeline_mode<synchronous>, transform_indices = @transform_4, window_bounds = array<i64: 1, 128>}, {transform_indices = @transform_5, window_bounds = array<i64: 8, 128>}]} {
    %c0 = arith.constant 0 : index
    %c0_0 = arith.constant 0 : index
    %0 = vector.load %arg2[%c0, %c0_0] : memref<8x784xf32, #tpu.memory_space<vmem>>, vector<8x784xf32>
    %c0_1 = arith.constant 0 : index
    %c0_2 = arith.constant 0 : index
    %1 = vector.load %arg3[%c0_1, %c0_2] : memref<784x512xf32, #tpu.memory_space<vmem>>, vector<784x512xf32>
    %cst = arith.constant dense<0.000000e+00> : vector<8x512xf32>
    %2 = tpu.matmul %0, %1, %cst {dimension_numbers = #tpu.dot_dimension_numbers<[1], [0], [0], [1], [0, 0, 1, 1], [], []>} : vector<8x784xf32>, vector<784x512xf32>, vector<8x512xf32> -> vector<8x512xf32>
    %c0_3 = arith.constant 0 : index
    %c0_4 = arith.constant 0 : index
    %3 = vector.load %arg4[%c0_3, %c0_4] : memref<1x512xf32, #tpu.memory_space<vmem>>, vector<1x512xf32>
    %4 = vector.broadcast %3 : vector<1x512xf32> to vector<8x512xf32>
    %5 = arith.addf %2, %4 : vector<8x512xf32>
    %cst_5 = arith.constant 0.000000e+00 : f32
    %6 = vector.broadcast %cst_5 : f32 to vector<8x512xf32>
    %7 = arith.maximumf %5, %6 : vector<8x512xf32>
    %c0_6 = arith.constant 0 : index
    %8 = memref.load %arg1[%c0_6] : memref<1xi32, #tpu.memory_space<smem>>
    %c8_i32 = arith.constant 8 : i32
    %9 = arith.muli %arg0, %c8_i32 : i32
    %10 = tpu.iota {dimensions = array<i32: 0>} : vector<8x512xi32>
    %11 = vector.broadcast %9 : i32 to vector<8x512xi32>
    %12 = arith.addi %10, %11 : vector<8x512xi32>
    %13 = tpu.iota {dimensions = array<i32: 1>} : vector<8x512xi32>
    %c-1640531535_i32 = arith.constant -1640531535 : i32
    %14 = vector.broadcast %c-1640531535_i32 : i32 to vector<8x512xi32>
    %15 = arith.muli %12, %14 : vector<8x512xi32>
    %c-2048144777_i32 = arith.constant -2048144777 : i32
    %16 = vector.broadcast %c-2048144777_i32 : i32 to vector<8x512xi32>
    %17 = arith.muli %13, %16 : vector<8x512xi32>
    %18 = arith.xori %15, %17 : vector<8x512xi32>
    %19 = vector.broadcast %8 : i32 to vector<8x512xi32>
    %20 = arith.addi %18, %19 : vector<8x512xi32>
    %c16_i32 = arith.constant 16 : i32
    %21 = vector.broadcast %c16_i32 : i32 to vector<8x512xi32>
    %22 = arith.shrui %20, %21 : vector<8x512xi32>
    %23 = arith.xori %20, %22 : vector<8x512xi32>
    %c2146121005_i32 = arith.constant 2146121005 : i32
    %24 = vector.broadcast %c2146121005_i32 : i32 to vector<8x512xi32>
    %25 = arith.muli %23, %24 : vector<8x512xi32>
    %c15_i32 = arith.constant 15 : i32
    %26 = vector.broadcast %c15_i32 : i32 to vector<8x512xi32>
    %27 = arith.shrui %25, %26 : vector<8x512xi32>
    %28 = arith.xori %25, %27 : vector<8x512xi32>
    %c-2073254261_i32 = arith.constant -2073254261 : i32
    %29 = vector.broadcast %c-2073254261_i32 : i32 to vector<8x512xi32>
    %30 = arith.muli %28, %29 : vector<8x512xi32>
    %c16_i32_7 = arith.constant 16 : i32
    %31 = vector.broadcast %c16_i32_7 : i32 to vector<8x512xi32>
    %32 = arith.shrui %30, %31 : vector<8x512xi32>
    %33 = arith.xori %30, %32 : vector<8x512xi32>
    %c1_i32 = arith.constant 1 : i32
    %34 = vector.broadcast %c1_i32 : i32 to vector<8x512xi32>
    %35 = arith.andi %33, %34 : vector<8x512xi32>
    %c0_i32 = arith.constant 0 : i32
    %36 = vector.broadcast %c0_i32 : i32 to vector<8x512xi32>
    %37 = arith.cmpi ne, %35, %36 : vector<8x512xi32>
    %cst_8 = arith.constant 2.000000e+00 : f32
    %38 = vector.broadcast %cst_8 : f32 to vector<8x512xf32>
    %39 = arith.mulf %7, %38 : vector<8x512xf32>
    %cst_9 = arith.constant 0.000000e+00 : f32
    %40 = vector.broadcast %cst_9 : f32 to vector<8x512xf32>
    %41 = arith.select %37, %39, %40 : vector<8x512xi1>, vector<8x512xf32>
    %c0_10 = arith.constant 0 : index
    %c0_11 = arith.constant 0 : index
    %42 = vector.load %arg5[%c0_10, %c0_11] : memref<512x128xf32, #tpu.memory_space<vmem>>, vector<512x128xf32>
    %cst_12 = arith.constant dense<0.000000e+00> : vector<8x128xf32>
    %43 = tpu.matmul %41, %42, %cst_12 {dimension_numbers = #tpu.dot_dimension_numbers<[1], [0], [0], [1], [0, 0, 1, 1], [], []>} : vector<8x512xf32>, vector<512x128xf32>, vector<8x128xf32> -> vector<8x128xf32>
    %c0_13 = arith.constant 0 : index
    %c0_14 = arith.constant 0 : index
    %44 = vector.load %arg6[%c0_13, %c0_14] : memref<1x128xf32, #tpu.memory_space<vmem>>, vector<1x128xf32>
    %45 = vector.broadcast %44 : vector<1x128xf32> to vector<8x128xf32>
    %46 = arith.addf %43, %45 : vector<8x128xf32>
    %c0_15 = arith.constant 0 : index
    %c0_16 = arith.constant 0 : index
    %47 = vector.load %arg7[%c0_15, %c0_16] : memref<8x128xf32, #tpu.memory_space<vmem>>, vector<8x128xf32>
    tpu.vector_store %arg7[%c0_15, %c0_16], %46 {strides = array<i32>} : memref<8x128xf32, #tpu.memory_space<vmem>>, vector<8x128xf32>,
    return
  }
  func.func @transform_0(%arg0: i32, %arg1: memref<1xi32, #tpu.memory_space<smem>>) -> (i32, i32) {
    %c0_i32 = arith.constant 0 : i32
    %c0_i32_0 = arith.constant 0 : i32
    return %arg0, %c0_i32 : i32, i32
  }
  func.func @transform_1(%arg0: i32, %arg1: memref<1xi32, #tpu.memory_space<smem>>) -> (i32, i32) {
    %c0_i32 = arith.constant 0 : i32
    %c0_i32_0 = arith.constant 0 : i32
    %c0_i32_1 = arith.constant 0 : i32
    return %c0_i32, %c0_i32_0 : i32, i32
  }
  func.func @transform_2(%arg0: i32, %arg1: memref<1xi32, #tpu.memory_space<smem>>) -> (i32, i32) {
    %c0_i32 = arith.constant 0 : i32
    %c0_i32_0 = arith.constant 0 : i32
    %c0_i32_1 = arith.constant 0 : i32
    return %c0_i32, %c0_i32_0 : i32, i32
  }
  func.func @transform_3(%arg0: i32, %arg1: memref<1xi32, #tpu.memory_space<smem>>) -> (i32, i32) {
    %c0_i32 = arith.constant 0 : i32
    %c0_i32_0 = arith.constant 0 : i32
    %c0_i32_1 = arith.constant 0 : i32
    return %c0_i32, %c0_i32_0 : i32, i32
  }
  func.func @transform_4(%arg0: i32, %arg1: memref<1xi32, #tpu.memory_space<smem>>) -> (i32, i32) {
    %c0_i32 = arith.constant 0 : i32
    %c0_i32_0 = arith.constant 0 : i32
    %c0_i32_1 = arith.constant 0 : i32
    return %c0_i32, %c0_i32_0 : i32, i32
  }
  func.func @transform_5(%arg0: i32, %arg1: memref<1xi32, #tpu.memory_space<smem>>) -> (i32, i32) {
    %c0_i32 = arith.constant 0 : i32
    %c0_i32_0 = arith.constant 0 : i32
    return %arg0, %c0_i32 : i32, i32
  }
}

</mosaic_0001>

<bundles_post_ra>
// kernel: tpu_custom_call.1
= control target key start
LH: loop header
LB: loop body
LE: loop exit
PB: predicated region body
PF: predicated region fallthrough
CT: control target
= control target key end

     0   :  { %12 = vsyncpa [#allocation5], 0  ;;  %s1709_s0 = inlined_call_operand.<no memory space> [shape: s32[1], index: 0, kind: input, shape index: {}]   ;;  %s1710_s1 = inlined_call_operand.hbm [shape: f32[8,784], index: 1, kind: input, shape index: {}]   ;;  %s1711_s2 = inlined_call_operand.hbm [shape: f32[784,512], index: 2, kind: input, shape index: {}]   ;;  %s1712_s3 = inlined_call_operand.hbm [shape: f32[1,512], index: 3, kind: input, shape index: {}]   ;;  %s1713_s4 = inlined_call_operand.hbm [shape: f32[512,128], index: 4, kind: input, shape index: {}]   ;;  %s1714_s5 = inlined_call_operand.hbm [shape: f32[1,128], index: 5, kind: input, shape index: {}]   ;;  %s1715_s6 = inlined_call_operand.hbm [shape: f32[8,128], index: 6, kind: output, shape index: {}]  }
   0x1   :  { %13 = vsyncpa [#allocation8], 0 }
   0x2   :  { %14 = vsyncpa [#allocation11], 0 }
   0x3   :  { %15 = vsyncpa [#allocation6], 0  ;;  %s1603_s21 = smov [#allocation7]  }
   0x4   :  { %s31_s22 = sshll.u32 %s1603_s21, 4  ;;  %s32_s22 = int_to_ptr.vmem [resolvable:$true] %s31_s22 }
   0x5   :  { %s1483_s23 = scalar_lea.vmem %s32_s22, 50176  ;;  %p1488_p1 = scmp.lt.s32.totalorder %s32_s22, %s32_s22 }
   0x6   :  { %p1484_p0 = scmp.ne.s32.totalorder %s32_s22, %s1483_s23  ;;  %p1489_p2 = scmp.lt.s32.totalorder %s1483_s23, %s1483_s23 }
   0x8   :  { %p1490_p3 = por %p1489_p2, %p1488_p1 }
   0xa   :  { %p1491_p4 = pnand %p1490_p3, %p1484_p0 }
   0xc   :  { %1494 = shalt.err (!%p1491_p4)
}
   0xd   :  { %s1604_s24 = smov 512   ;;  %s1605_s25 = smov 32  }
   0xe   :  { %37 = dma.hbm_to_vmem [thread:$0]  %s1711_s2, 50176, %s32_s22, [#allocation8], %s1604_s24, %s1604_s24, %s1605_s25  }
   0xf   :  { %s1606_s28 = smov [#allocation10]  }
  0x10   :  { %s53_s29 = sshll.u32 %s1606_s28, 4  ;;  %s54_s29 = int_to_ptr.vmem [resolvable:$true] %s53_s29 }
  0x11   :  { %s1503_s30 = scalar_lea.vmem %s54_s29, 8192  ;;  %p1508_p6 = scmp.lt.s32.totalorder %s54_s29, %s54_s29 }
  0x12   :  { %p1504_p5 = scmp.ne.s32.totalorder %s54_s29, %s1503_s30  ;;  %p1509_p7 = scmp.lt.s32.totalorder %s1503_s30, %s1503_s30 }
  0x14   :  { %p1510_p8 = por %p1509_p7, %p1508_p6 }
  0x16   :  { %p1511_p9 = pnand %p1510_p8, %p1504_p5 }
  0x18   :  { %1514 = shalt.err (!%p1511_p9)
}
  0x19   :  { %s1607_s7 = smov 128   ;;  %s1608_s8 = smov 8  }
  0x1a   :  { %59 = dma.hbm_to_vmem [thread:$0]  %s1713_s4, 8192, %s54_s29, [#allocation11], %s1607_s7, %s1607_s7, %s1608_s8  }
  0x1b   :  { %s1609_s11 = smov [#allocation4]   ;;  %s1610_s13 = smov [#allocation9]  }
  0x1c   :  { %s22_s12 = sshll.u32 %s1609_s11, 4  ;;  %s44_s2 = sshll.u32 %s1610_s13, 4  ;;  %s23_s12 = int_to_ptr.vmem [resolvable:$true] %s22_s12  ;;  %s45_s2 = int_to_ptr.vmem [resolvable:$true] %s44_s2 }
  0x1d   :  { %s1523_s14 = scalar_lea.vmem %s23_s12, 896  ;;  %p1528_p11 = scmp.lt.s32.totalorder %s23_s12, %s23_s12 }
  0x1e   :  { %p1524_p10 = scmp.ne.s32.totalorder %s23_s12, %s1523_s14  ;;  %p1529_p12 = scmp.lt.s32.totalorder %s1523_s14, %s1523_s14 }
  0x20   :  { %p1530_p13 = por %p1529_p12, %p1528_p11 }
  0x22   :  { %p1531_p0 = pnand %p1530_p13, %p1524_p10 }
  0x24   :  { %1534 = shalt.err (!%p1531_p0)
}
  0x25   :  { %25 = dma.hbm_to_vmem [thread:$0]  %s1710_s1, 896, %s23_s12, [#allocation5]  }
  0x26   :  { %s1543_s17 = scalar_lea.vmem %s45_s2, 64  ;;  %p1548_p2 = scmp.lt.s32.totalorder %s45_s2, %s45_s2 }
  0x27   :  { %p1544_p1 = scmp.ne.s32.totalorder %s45_s2, %s1543_s17  ;;  %p1549_p3 = scmp.lt.s32.totalorder %s1543_s17, %s1543_s17 }
  0x29   :  { %p1550_p4 = por %p1549_p3, %p1548_p2 }
  0x2b   :  { %p1551_p5 = pnand %p1550_p4, %p1544_p1 }
  0x2d   :  { %1554 = shalt.err (!%p1551_p5)
}
  0x2e   :  { %47 = dma.hbm_to_vmem [thread:$0]  %s1712_s3, 64, %s45_s2, [#allocation8]  }
  0x2f   :  { %s1611_s19 = smov [#allocation12]  }
  0x30   :  { %s66_s20 = sshll.u32 %s1611_s19, 4  ;;  %s67_s20 = int_to_ptr.vmem [resolvable:$true] %s66_s20 }
  0x31   :  { %s1563_s21 = scalar_lea.vmem %s67_s20, 16  ;;  %s1567_s22 = scalar_lea.vmem %s67_s20, 32 }
  0x32   :  { %p1564_p6 = scmp.ne.s32.totalorder %s67_s20, %s1563_s21  ;;  %p1568_p7 = scmp.lt.s32.totalorder %s67_s20, %s67_s20 }
  0x33   :  { %p1569_p8 = scmp.lt.s32.totalorder %s1567_s22, %s1563_s21 }
  0x35   :  { %p1570_p9 = por %p1569_p8, %p1568_p7 }
  0x37   :  { %p1571_p10 = pnand %p1570_p9, %p1564_p6 }
  0x39   :  { %1574 = shalt.err (!%p1571_p10)
}
  0x3a   :  { %69 = dma.hbm_to_vmem [thread:$0]  %s1714_s5, 16, %s67_s20, [#allocation11]  }
  0x3b   :  { %1595 = dma.done.wait [#allocation5], 896  }
  0x3c   :  { %1596 = vsyncadd [#allocation5], 4294966400 }
  0x3d   :  { %1597 = dma.done.wait [#allocation8], 50240  }
  0x3e   :  { %1598 = vsyncadd [#allocation8], 4294917056 }
  0x3f   :  { %1599 = dma.done.wait [#allocation11], 8208  }
  0x40   :  { %1600 = vsyncadd [#allocation11], 4294959088  ;;  %v153_v0 = vld [vmem:[#allocation7 + $0x1e8] sm:$0xff]  ;;  %v152_v2 = vld [vmem:[#allocation7 + $0x1e0] sm:$0xff]  ;;  %vm506_vm0 = vcmask 130048  }
  0x41   :  { %v281_v1 = vld [vmem:[#allocation7 + $0x5e8] sm:$0xff]  ;;  %510 = vmatprep.subr.mxu0 %v153_v0  ;;  %v280_v3 = vld [vmem:[#allocation7 + $0x5e0] sm:$0xff] }
  0x42   :  { %581 = vmatprep.subr.mxu1 %v281_v1  ;;  %v149_v4 = vld [vmem:[#allocation7 + $0x1c8] sm:$0xff]  ;;  %511 = vmatpush1.msra.mxu0 %v152_v2  ;;  %v148_v6 = vld [vmem:[#allocation7 + $0x1c0] sm:$0xff] }
  0x43   :  { %v277_v5 = vld [vmem:[#allocation7 + $0x5c8] sm:$0xff]  ;;  %582 = vmatpush1.msra.mxu1 %v280_v3  ;;  %v276_v7 = vld [vmem:[#allocation7 + $0x5c0] sm:$0xff]  ;;  %512 = vmatprep.subr.mxu0 %v149_v4 }
  0x44   :  { %v145_v8 = vld [vmem:[#allocation7 + $0x1a8] sm:$0xff]  ;;  %583 = vmatprep.subr.mxu1 %v277_v5  ;;  %v144_v10 = vld [vmem:[#allocation7 + $0x1a0] sm:$0xff]  ;;  %513 = vmatpush1.msra.mxu0 %v148_v6 }
  0x45   :  { %v273_v9 = vld [vmem:[#allocation7 + $0x5a8] sm:$0xff]  ;;  %v272_v11 = vld [vmem:[#allocation7 + $0x5a0] sm:$0xff]  ;;  %584 = vmatpush1.msra.mxu1 %v276_v7  ;;  %514 = vmatprep.subr.mxu0 %v145_v8 }
  0x46   :  { %v141_v12 = vld [vmem:[#allocation7 + $0x188] sm:$0xff]  ;;  %585 = vmatprep.subr.mxu1 %v273_v9  ;;  %v140_v14 = vld [vmem:[#allocation7 + $0x180] sm:$0xff]  ;;  %515 = vmatpush1.msra.mxu0 %v144_v10 }
  0x47   :  { %v269_v13 = vld [vmem:[#allocation7 + $0x588] sm:$0xff]  ;;  %v268_v15 = vld [vmem:[#allocation7 + $0x580] sm:$0xff]  ;;  %586 = vmatpush1.msra.mxu1 %v272_v11  ;;  %516 = vmatprep.subr.mxu0 %v141_v12 }
  0x48   :  { %v137_v16 = vld [vmem:[#allocation7 + $0x168] sm:$0xff]  ;;  %587 = vmatprep.subr.mxu1 %v269_v13  ;;  %v136_v18 = vld [vmem:[#allocation7 + $0x160] sm:$0xff]  ;;  %517 = vmatpush1.msra.mxu0 %v140_v14 }
  0x49   :  { %v265_v17 = vld [vmem:[#allocation7 + $0x568] sm:$0xff]  ;;  %v264_v19 = vld [vmem:[#allocation7 + $0x560] sm:$0xff]  ;;  %588 = vmatpush1.msra.mxu1 %v268_v15  ;;  %518 = vmatprep.subr.mxu0 %v137_v16 }
  0x4a   :  { %v133_v20 = vld [vmem:[#allocation7 + $0x148] sm:$0xff]  ;;  %589 = vmatprep.subr.mxu1 %v265_v17  ;;  %v132_v22 = vld [vmem:[#allocation7 + $0x140] sm:$0xff]  ;;  %519 = vmatpush1.msra.mxu0 %v136_v18 }
  0x4b   :  { %v261_v21 = vld [vmem:[#allocation7 + $0x548] sm:$0xff]  ;;  %v260_v23 = vld [vmem:[#allocation7 + $0x540] sm:$0xff]  ;;  %590 = vmatpush1.msra.mxu1 %v264_v19  ;;  %520 = vmatprep.subr.mxu0 %v133_v20 }
  0x4c   :  { %v129_v24 = vld [vmem:[#allocation7 + $0x128] sm:$0xff]  ;;  %591 = vmatprep.subr.mxu1 %v261_v21  ;;  %v128_v26 = vld [vmem:[#allocation7 + $0x120] sm:$0xff]  ;;  %521 = vmatpush1.msra.mxu0 %v132_v22 }
  0x4d   :  { %v257_v25 = vld [vmem:[#allocation7 + $0x528] sm:$0xff]  ;;  %v256_v27 = vld [vmem:[#allocation7 + $0x520] sm:$0xff]  ;;  %592 = vmatpush1.msra.mxu1 %v260_v23  ;;  %522 = vmatprep.subr.mxu0 %v129_v24 }
  0x4e   :  { %v125_v28 = vld [vmem:[#allocation7 + $0x108] sm:$0xff]  ;;  %593 = vmatprep.subr.mxu1 %v257_v25  ;;  %v124_v30 = vld [vmem:[#allocation7 + $0x100] sm:$0xff]  ;;  %523 = vmatpush1.msra.mxu0 %v128_v26 }
  0x4f   :  { %v253_v29 = vld [vmem:[#allocation7 + $0x508] sm:$0xff]  ;;  %v252_v31 = vld [vmem:[#allocation7 + $0x500] sm:$0xff]  ;;  %594 = vmatpush1.msra.mxu1 %v256_v27  ;;  %524 = vmatprep.subr.mxu0 %v125_v28 }
  0x50   :  { %v121_v32 = vld [vmem:[#allocation7 + $0xe8] sm:$0xff]  ;;  %595 = vmatprep.subr.mxu1 %v253_v29  ;;  %v120_v34 = vld [vmem:[#allocation7 + $0xe0] sm:$0xff]  ;;  %525 = vmatpush1.msra.mxu0 %v124_v30 }
  0x51   :  { %v249_v33 = vld [vmem:[#allocation7 + $0x4e8] sm:$0xff]  ;;  %v248_v35 = vld [vmem:[#allocation7 + $0x4e0] sm:$0xff]  ;;  %596 = vmatpush1.msra.mxu1 %v252_v31  ;;  %526 = vmatprep.subr.mxu0 %v121_v32 }
  0x52   :  { %v117_v36 = vld [vmem:[#allocation7 + $0xc8] sm:$0xff]  ;;  %597 = vmatprep.subr.mxu1 %v249_v33  ;;  %v116_v38 = vld [vmem:[#allocation7 + $0xc0] sm:$0xff]  ;;  %527 = vmatpush1.msra.mxu0 %v120_v34 }
  0x53   :  { %v245_v37 = vld [vmem:[#allocation7 + $0x4c8] sm:$0xff]  ;;  %v244_v39 = vld [vmem:[#allocation7 + $0x4c0] sm:$0xff]  ;;  %598 = vmatpush1.msra.mxu1 %v248_v35  ;;  %528 = vmatprep.subr.mxu0 %v117_v36 }
  0x54   :  { %v113_v40 = vld [vmem:[#allocation7 + $0xa8] sm:$0xff]  ;;  %599 = vmatprep.subr.mxu1 %v245_v37  ;;  %v112_v42 = vld [vmem:[#allocation7 + $0xa0] sm:$0xff]  ;;  %529 = vmatpush1.msra.mxu0 %v116_v38 }
  0x55   :  { %v241_v41 = vld [vmem:[#allocation7 + $0x4a8] sm:$0xff]  ;;  %v240_v43 = vld [vmem:[#allocation7 + $0x4a0] sm:$0xff]  ;;  %600 = vmatpush1.msra.mxu1 %v244_v39  ;;  %530 = vmatprep.subr.mxu0 %v113_v40 }
  0x56   :  { %v109_v44 = vld [vmem:[#allocation7 + $0x88] sm:$0xff]  ;;  %601 = vmatprep.subr.mxu1 %v241_v41  ;;  %v108_v46 = vld [vmem:[#allocation7 + $0x80] sm:$0xff]  ;;  %531 = vmatpush1.msra.mxu0 %v112_v42 }
  0x57   :  { %v237_v45 = vld [vmem:[#allocation7 + $0x488] sm:$0xff]  ;;  %v236_v47 = vld [vmem:[#allocation7 + $0x480] sm:$0xff]  ;;  %602 = vmatpush1.msra.mxu1 %v240_v43  ;;  %532 = vmatprep.subr.mxu0 %v109_v44 }
  0x58   :  { %v105_v48 = vld [vmem:[#allocation7 + $0x68] sm:$0xff]  ;;  %603 = vmatprep.subr.mxu1 %v237_v45  ;;  %v104_v50 = vld [vmem:[#allocation7 + $0x60] sm:$0xff]  ;;  %533 = vmatpush1.msra.mxu0 %v108_v46 }
  0x59   :  { %v233_v49 = vld [vmem:[#allocation7 + $0x468] sm:$0xff]  ;;  %v232_v51 = vld [vmem:[#allocation7 + $0x460] sm:$0xff]  ;;  %604 = vmatpush1.msra.mxu1 %v236_v47  ;;  %534 = vmatprep.subr.mxu0 %v105_v48 }
  0x5a   :  { %v101_v52 = vld [vmem:[#allocation7 + $0x48] sm:$0xff]  ;;  %605 = vmatprep.subr.mxu1 %v233_v49  ;;  %v100_v54 = vld [vmem:[#allocation7 + $0x40] sm:$0xff]  ;;  %535 = vmatpush1.msra.mxu0 %v104_v50 }
  0x5b   :  { %v229_v53 = vld [vmem:[#allocation7 + $0x448] sm:$0xff]  ;;  %v228_v55 = vld [vmem:[#allocation7 + $0x440] sm:$0xff]  ;;  %606 = vmatpush1.msra.mxu1 %v232_v51  ;;  %536 = vmatprep.subr.mxu0 %v101_v52 }
  0x5c   :  { %v97_v56 = vld [vmem:[#allocation7 + $0x28] sm:$0xff]  ;;  %607 = vmatprep.subr.mxu1 %v229_v53  ;;  %v96_v58 = vld [vmem:[#allocation7 + $0x20] sm:$0xff]  ;;  %537 = vmatpush1.msra.mxu0 %v100_v54 }
  0x5d   :  { %v225_v57 = vld [vmem:[#allocation7 + $0x428] sm:$0xff]  ;;  %v224_v59 = vld [vmem:[#allocation7 + $0x420] sm:$0xff]  ;;  %608 = vmatpush1.msra.mxu1 %v228_v55  ;;  %538 = vmatprep.subr.mxu0 %v97_v56 }
  0x5e   :  { %v93_v60 = vld [vmem:[#allocation7 + $0x8] sm:$0xff]  ;;  %609 = vmatprep.subr.mxu1 %v225_v57  ;;  %v92_v62 = vld [vmem:[#allocation7] sm:$0xff]  ;;  %539 = vmatpush1.msra.mxu0 %v96_v58 }
  0x5f   :  { %v221_v61 = vld [vmem:[#allocation7 + $0x408] sm:$0xff]  ;;  %v220_v63 = vld [vmem:[#allocation7 + $0x400] sm:$0xff]  ;;  %610 = vmatpush1.msra.mxu1 %v224_v59  ;;  %540 = vmatprep.subr.mxu0 %v93_v60 }
  0x60   :  { %v217_v0 = vld [vmem:[#allocation7 + $0x3e8] sm:$0xff]  ;;  %611 = vmatprep.subr.mxu1 %v221_v61  ;;  %v216_v2 = vld [vmem:[#allocation7 + $0x3e0] sm:$0xff]  ;;  %541 = vmatpush1.msra.mxu0 %v92_v62 }
  0x61   :  { %v345_v1 = vld [vmem:[#allocation7 + $0x7e8] sm:$0xff]  ;;  %v344_v3 = vld [vmem:[#allocation7 + $0x7e0] sm:$0xff]  ;;  %612 = vmatpush1.msra.mxu1 %v220_v63  ;;  %542 = vmatprep.subr.mxu0 %v217_v0  ;;  %v1664_v63 = vld [vmem:[#allocation4 + $0x8] sm:$0xff] }
  0x62   :  { %v213_v4 = vld [vmem:[#allocation7 + $0x3c8] sm:$0xff]  ;;  %613 = vmatprep.subr.mxu1 %v345_v1  ;;  %v212_v6 = vld [vmem:[#allocation7 + $0x3c0] sm:$0xff]  ;;  %543 = vmatpush2.msra.mxu0 %v216_v2 }
  0x63   :  { %v341_v5 = vld [vmem:[#allocation7 + $0x7c8] sm:$0xff]  ;;  %v340_v7 = vld [vmem:[#allocation7 + $0x7c0] sm:$0xff]  ;;  %614 = vmatpush2.msra.mxu1 %v344_v3  ;;  %544 = vmatprep.subr.mxu0 %v213_v4  ;;  %v87_v3 = vld [vmem:[#allocation4 + $0x10] sm:$0xff] }
  0x64   :  { %v209_v8 = vld [vmem:[#allocation7 + $0x3a8] sm:$0xff]  ;;  %615 = vmatprep.subr.mxu1 %v341_v5  ;;  %v208_v10 = vld [vmem:[#allocation7 + $0x3a0] sm:$0xff]  ;;  %545 = vmatpush2.msra.mxu0 %v212_v6 }
  0x65   :  { %v337_v9 = vld [vmem:[#allocation7 + $0x7a8] sm:$0xff]  ;;  %v336_v11 = vld [vmem:[#allocation7 + $0x7a0] sm:$0xff]  ;;  %616 = vmatpush2.msra.mxu1 %v340_v7  ;;  %546 = vmatprep.subr.mxu0 %v209_v8 }
  0x66   :  { %v205_v12 = vld [vmem:[#allocation7 + $0x388] sm:$0xff]  ;;  %617 = vmatprep.subr.mxu1 %v337_v9  ;;  %v204_v14 = vld [vmem:[#allocation7 + $0x380] sm:$0xff]  ;;  %547 = vmatpush2.msra.mxu0 %v208_v10 }
  0x67   :  { %v333_v13 = vld [vmem:[#allocation7 + $0x788] sm:$0xff]  ;;  %v332_v15 = vld [vmem:[#allocation7 + $0x780] sm:$0xff]  ;;  %618 = vmatpush2.msra.mxu1 %v336_v11  ;;  %548 = vmatprep.subr.mxu0 %v205_v12 }
  0x68   :  { %v201_v16 = vld [vmem:[#allocation7 + $0x368] sm:$0xff]  ;;  %619 = vmatprep.subr.mxu1 %v333_v13  ;;  %v200_v18 = vld [vmem:[#allocation7 + $0x360] sm:$0xff]  ;;  %549 = vmatpush2.msra.mxu0 %v204_v14  ;;  %v91_v13 = vld [vmem:[#allocation4 + $0x30] sm:$0xff] }
  0x69   :  { %v329_v17 = vld [vmem:[#allocation7 + $0x768] sm:$0xff]  ;;  %v328_v19 = vld [vmem:[#allocation7 + $0x760] sm:$0xff]  ;;  %620 = vmatpush2.msra.mxu1 %v332_v15  ;;  %550 = vmatprep.subr.mxu0 %v201_v16  ;;  %v155_v14 = vld [vmem:[#allocation7 + $0x1f8] sm:$0xff] }
  0x6a   :  { %v197_v20 = vld [vmem:[#allocation7 + $0x348] sm:$0xff]  ;;  %621 = vmatprep.subr.mxu1 %v329_v17  ;;  %v196_v22 = vld [vmem:[#allocation7 + $0x340] sm:$0xff]  ;;  %551 = vmatpush2.msra.mxu0 %v200_v18  ;;  %v154_v16 = vld [vmem:[#allocation7 + $0x1f0] sm:$0xff]  ;;  %v1612_v17 = vmov 0.0  }
  0x6b   :  { %v325_v21 = vld [vmem:[#allocation7 + $0x748] sm:$0xff]  ;;  %v324_v23 = vld [vmem:[#allocation7 + $0x740] sm:$0xff]  ;;  %622 = vmatpush2.msra.mxu1 %v328_v19  ;;  %552 = vmatprep.subr.mxu0 %v197_v20  ;;  %v151_v19 = vld [vmem:[#allocation7 + $0x1d8] sm:$0xff] }
  0x6c   :  { %v193_v24 = vld [vmem:[#allocation7 + $0x328] sm:$0xff]  ;;  %623 = vmatprep.subr.mxu1 %v325_v21  ;;  %v192_v26 = vld [vmem:[#allocation7 + $0x320] sm:$0xff]  ;;  %553 = vmatpush2.msra.mxu0 %v196_v22  ;;  %v150_v21 = vld [vmem:[#allocation7 + $0x1d0] sm:$0xff] }
  0x6d   :  { %v321_v25 = vld [vmem:[#allocation7 + $0x728] sm:$0xff]  ;;  %v320_v27 = vld [vmem:[#allocation7 + $0x720] sm:$0xff]  ;;  %624 = vmatpush2.msra.mxu1 %v324_v23  ;;  %554 = vmatprep.subr.mxu0 %v193_v24  ;;  %v147_v23 = vld [vmem:[#allocation7 + $0x1b8] sm:$0xff] }
  0x6e   :  { %v189_v28 = vld [vmem:[#allocation7 + $0x308] sm:$0xff]  ;;  %625 = vmatprep.subr.mxu1 %v321_v25  ;;  %v188_v30 = vld [vmem:[#allocation7 + $0x300] sm:$0xff]  ;;  %555 = vmatpush2.msra.mxu0 %v192_v26  ;;  %v146_v25 = vld [vmem:[#allocation7 + $0x1b0] sm:$0xff] }
  0x6f   :  { %v317_v29 = vld [vmem:[#allocation7 + $0x708] sm:$0xff]  ;;  %v316_v31 = vld [vmem:[#allocation7 + $0x700] sm:$0xff]  ;;  %626 = vmatpush2.msra.mxu1 %v320_v27  ;;  %556 = vmatprep.subr.mxu0 %v189_v28  ;;  %v143_v27 = vld [vmem:[#allocation7 + $0x198] sm:$0xff] }
  0x70   :  { %v185_v32 = vld [vmem:[#allocation7 + $0x2e8] sm:$0xff]  ;;  %627 = vmatprep.subr.mxu1 %v317_v29  ;;  %v184_v34 = vld [vmem:[#allocation7 + $0x2e0] sm:$0xff]  ;;  %557 = vmatpush2.msra.mxu0 %v188_v30  ;;  %v142_v29 = vld [vmem:[#allocation7 + $0x190] sm:$0xff] }
  0x71   :  { %v313_v33 = vld [vmem:[#allocation7 + $0x6e8] sm:$0xff]  ;;  %v312_v35 = vld [vmem:[#allocation7 + $0x6e0] sm:$0xff]  ;;  %628 = vmatpush2.msra.mxu1 %v316_v31  ;;  %558 = vmatprep.subr.mxu0 %v185_v32  ;;  %v139_v31 = vld [vmem:[#allocation7 + $0x178] sm:$0xff] }
  0x72   :  { %v181_v36 = vld [vmem:[#allocation7 + $0x2c8] sm:$0xff]  ;;  %629 = vmatprep.subr.mxu1 %v313_v33  ;;  %v180_v38 = vld [vmem:[#allocation7 + $0x2c0] sm:$0xff]  ;;  %559 = vmatpush2.msra.mxu0 %v184_v34  ;;  %v138_v33 = vld [vmem:[#allocation7 + $0x170] sm:$0xff] }
  0x73   :  { %v309_v37 = vld [vmem:[#allocation7 + $0x6c8] sm:$0xff]  ;;  %v308_v39 = vld [vmem:[#allocation7 + $0x6c0] sm:$0xff]  ;;  %630 = vmatpush2.msra.mxu1 %v312_v35  ;;  %560 = vmatprep.subr.mxu0 %v181_v36  ;;  %v135_v35 = vld [vmem:[#allocation7 + $0x158] sm:$0xff] }
  0x74   :  { %v177_v40 = vld [vmem:[#allocation7 + $0x2a8] sm:$0xff]  ;;  %631 = vmatprep.subr.mxu1 %v309_v37  ;;  %v176_v42 = vld [vmem:[#allocation7 + $0x2a0] sm:$0xff]  ;;  %561 = vmatpush2.msra.mxu0 %v180_v38  ;;  %v134_v37 = vld [vmem:[#allocation7 + $0x150] sm:$0xff] }
  0x75   :  { %v305_v41 = vld [vmem:[#allocation7 + $0x6a8] sm:$0xff]  ;;  %v304_v43 = vld [vmem:[#allocation7 + $0x6a0] sm:$0xff]  ;;  %632 = vmatpush2.msra.mxu1 %v308_v39  ;;  %562 = vmatprep.subr.mxu0 %v177_v40  ;;  %v131_v39 = vld [vmem:[#allocation7 + $0x138] sm:$0xff] }
  0x76   :  { %v173_v44 = vld [vmem:[#allocation7 + $0x288] sm:$0xff]  ;;  %633 = vmatprep.subr.mxu1 %v305_v41  ;;  %v172_v46 = vld [vmem:[#allocation7 + $0x280] sm:$0xff]  ;;  %563 = vmatpush2.msra.mxu0 %v176_v42  ;;  %v130_v41 = vld [vmem:[#allocation7 + $0x130] sm:$0xff] }
  0x77   :  { %v301_v45 = vld [vmem:[#allocation7 + $0x688] sm:$0xff]  ;;  %v300_v47 = vld [vmem:[#allocation7 + $0x680] sm:$0xff]  ;;  %634 = vmatpush2.msra.mxu1 %v304_v43  ;;  %564 = vmatprep.subr.mxu0 %v173_v44  ;;  %v127_v43 = vld [vmem:[#allocation7 + $0x118] sm:$0xff] }
  0x78   :  { %v169_v48 = vld [vmem:[#allocation7 + $0x268] sm:$0xff]  ;;  %635 = vmatprep.subr.mxu1 %v301_v45  ;;  %v168_v50 = vld [vmem:[#allocation7 + $0x260] sm:$0xff]  ;;  %565 = vmatpush2.msra.mxu0 %v172_v46  ;;  %v126_v45 = vld [vmem:[#allocation7 + $0x110] sm:$0xff] }
  0x79   :  { %v297_v49 = vld [vmem:[#allocation7 + $0x668] sm:$0xff]  ;;  %v296_v51 = vld [vmem:[#allocation7 + $0x660] sm:$0xff]  ;;  %636 = vmatpush2.msra.mxu1 %v300_v47  ;;  %566 = vmatprep.subr.mxu0 %v169_v48  ;;  %v123_v47 = vld [vmem:[#allocation7 + $0xf8] sm:$0xff] }
  0x7a   :  { %v165_v52 = vld [vmem:[#allocation7 + $0x248] sm:$0xff]  ;;  %637 = vmatprep.subr.mxu1 %v297_v49  ;;  %v164_v54 = vld [vmem:[#allocation7 + $0x240] sm:$0xff]  ;;  %567 = vmatpush2.msra.mxu0 %v168_v50  ;;  %v122_v49 = vld [vmem:[#allocation7 + $0xf0] sm:$0xff] }
  0x7b   :  { %v293_v53 = vld [vmem:[#allocation7 + $0x648] sm:$0xff]  ;;  %v292_v55 = vld [vmem:[#allocation7 + $0x640] sm:$0xff]  ;;  %638 = vmatpush2.msra.mxu1 %v296_v51  ;;  %568 = vmatprep.subr.mxu0 %v165_v52  ;;  %v119_v51 = vld [vmem:[#allocation7 + $0xd8] sm:$0xff] }
  0x7c   :  { %v161_v56 = vld [vmem:[#allocation7 + $0x228] sm:$0xff]  ;;  %639 = vmatprep.subr.mxu1 %v293_v53  ;;  %v160_v58 = vld [vmem:[#allocation7 + $0x220] sm:$0xff]  ;;  %569 = vmatpush2.msra.mxu0 %v164_v54  ;;  %v118_v53 = vld [vmem:[#allocation7 + $0xd0] sm:$0xff] }
  0x7d   :  { %v289_v57 = vld [vmem:[#allocation7 + $0x628] sm:$0xff]  ;;  %v288_v59 = vld [vmem:[#allocation7 + $0x620] sm:$0xff]  ;;  %640 = vmatpush2.msra.mxu1 %v292_v55  ;;  %570 = vmatprep.subr.mxu0 %v161_v56  ;;  %v115_v55 = vld [vmem:[#allocation7 + $0xb8] sm:$0xff] }
  0x7e   :  { %v157_v60 = vld [vmem:[#allocation7 + $0x208] sm:$0xff]  ;;  %641 = vmatprep.subr.mxu1 %v289_v57  ;;  %v156_v62 = vld [vmem:[#allocation7 + $0x200] sm:$0xff]  ;;  %571 = vmatpush2.msra.mxu0 %v160_v58  ;;  %v114_v57 = vld [vmem:[#allocation7 + $0xb0] sm:$0xff] }
  0x7f   :  { %v285_v61 = vld [vmem:[#allocation7 + $0x608] sm:$0xff]  ;;  %642 = vmatpush2.msra.mxu1 %v288_v59  ;;  %v284_v0 = vld [vmem:[#allocation7 + $0x600] sm:$0xff]  ;;  %572 = vmatprep.subr.mxu0 %v157_v60  ;;  %v111_v59 = vld [vmem:[#allocation7 + $0x98] sm:$0xff] }
  0x80   :  { %v88_v1 = vld [vmem:[#allocation4 + $0x18] sm:$0xff]  ;;  %643 = vmatprep.subr.mxu1 %v285_v61  ;;  %v1666_v2 = vld [vmem:[#allocation4] sm:$0xff]  ;;  %573 = vmatpush2.msra.mxu0 %v156_v62  ;;  %v110_v61 = vld [vmem:[#allocation7 + $0x90] sm:$0xff] }
  0x81   :  { %574 = vmatprep.mubr.f32.mxu0 %v1664_v63  ;;  %v409_v4 = vld [vmem:[#allocation7 + $0x9e8] sm:$0xff]  ;;  %644 = vmatpush2.msra.mxu1 %v284_v0  ;;  %v408_v6 = vld [vmem:[#allocation7 + $0x9e0] sm:$0xff]  ;;  %v107_v0 = vld [vmem:[#allocation7 + $0x78] sm:$0xff] }
  0x82   :  { %v481_v5 = vld [vmem:[#allocation7 + $0xc28] sm:$0xff]  ;;  %645 = vmatprep.mubr.f32.mxu1 %v88_v1  ;;  %v480_v7 = vld [vmem:[#allocation7 + $0xc20] sm:$0xff]  ;;  %575 = vmatmul.mubr.f32.vlgmr.msra.gmra.mxu0 %v1666_v2 }
  0x83   :  { %646 = vmatmul.mubr.f32.vlgmr.msra.gmra.mxu1 %v87_v3  ;;  %v405_v8 = vld [vmem:[#allocation7 + $0x9c8] sm:$0xff]  ;;  %652 = vmatprep.subr.mxu0 %v409_v4  ;;  %v404_v10 = vld [vmem:[#allocation7 + $0x9c0] sm:$0xff]  ;;  %v106_v3 = vld [vmem:[#allocation7 + $0x70] sm:$0xff] }
  0x84   :  { %v477_v9 = vld [vmem:[#allocation7 + $0xc08] sm:$0xff]  ;;  %751 = vmatprep.subr.mxu1 %v481_v5  ;;  %v476_v11 = vld [vmem:[#allocation7 + $0xc00] sm:$0xff]  ;;  %653 = vmatpush1.msra.mxu0 %v408_v6  ;;  %v103_v5 = vld [vmem:[#allocation7 + $0x58] sm:$0xff] }
  0x85   :  { %752 = vmatpush1.msra.mxu1 %v480_v7  ;;  %v401_v12 = vld [vmem:[#allocation7 + $0x9a8] sm:$0xff]  ;;  %654 = vmatprep.subr.mxu0 %v405_v8  ;;  %v400_v15 = vld [vmem:[#allocation7 + $0x9a0] sm:$0xff]  ;;  %v102_v7 = vld [vmem:[#allocation7 + $0x50] sm:$0xff] }
  0x86   :  { %753 = vmatprep.subr.mxu1 %v477_v9  ;;  %655 = vmatpush1.msra.mxu0 %v404_v10  ;;  %v397_v18 = vld [vmem:[#allocation7 + $0x988] sm:$0xff]  ;;  %v396_v20 = vld [vmem:[#allocation7 + $0x980] sm:$0xff]  ;;  %v99_v9 = vld [vmem:[#allocation7 + $0x38] sm:$0xff] }
  0x87   :  { %754 = vmatpush1.msra.mxu1 %v476_v11  ;;  %787 = vmatprep.mubr.f32.mxu1 %v1612_v17  ;;  %v393_v22 = vld [vmem:[#allocation7 + $0x968] sm:$0xff]  ;;  %v392_v24 = vld [vmem:[#allocation7 + $0x960] sm:$0xff]  ;;  %v98_v11 = vld [vmem:[#allocation7 + $0x30] sm:$0xff] }
  0x88   :  { %656 = vmatprep.subr.mxu0 %v401_v12  ;;  %1384 = vmatmul.mubr.msk.f32.vlgmr.msra.gmra.mxu1 %vm506_vm0, %v91_v13  ;;  %v389_v26 = vld [vmem:[#allocation7 + $0x948] sm:$0xff]  ;;  %v388_v28 = vld [vmem:[#allocation7 + $0x940] sm:$0xff]  ;;  %v95_v13 = vld [vmem:[#allocation7 + $0x18] sm:$0xff] }
  0x89   :  { %794 = vmatprep.subr.mxu1 %v155_v14  ;;  %657 = vmatpush1.msra.mxu0 %v400_v15  ;;  %v385_v30 = vld [vmem:[#allocation7 + $0x928] sm:$0xff]  ;;  %v384_v32 = vld [vmem:[#allocation7 + $0x920] sm:$0xff]  ;;  %v94_v15 = vld [vmem:[#allocation7 + $0x10] sm:$0xff] }
  0x8a   :  { %795 = vmatpush1.msra.mxu1 %v154_v16  ;;  %658 = vmatprep.subr.mxu0 %v397_v18  ;;  %v381_v34 = vld [vmem:[#allocation7 + $0x908] sm:$0xff]  ;;  %v380_v36 = vld [vmem:[#allocation7 + $0x900] sm:$0xff]  ;;  %v219_v18 = vld [vmem:[#allocation7 + $0x3f8] sm:$0xff] }
  0x8b   :  { %796 = vmatprep.subr.mxu1 %v151_v19  ;;  %659 = vmatpush1.msra.mxu0 %v396_v20  ;;  %v377_v38 = vld [vmem:[#allocation7 + $0x8e8] sm:$0xff]  ;;  %v376_v40 = vld [vmem:[#allocation7 + $0x8e0] sm:$0xff]  ;;  %v218_v20 = vld [vmem:[#allocation7 + $0x3f0] sm:$0xff] }
  0x8c   :  { %797 = vmatpush1.msra.mxu1 %v150_v21  ;;  %660 = vmatprep.subr.mxu0 %v393_v22  ;;  %v373_v42 = vld [vmem:[#allocation7 + $0x8c8] sm:$0xff]  ;;  %v372_v44 = vld [vmem:[#allocation7 + $0x8c0] sm:$0xff]  ;;  %v215_v22 = vld [vmem:[#allocation7 + $0x3d8] sm:$0xff] }
  0x8d   :  { %798 = vmatprep.subr.mxu1 %v147_v23  ;;  %661 = vmatpush1.msra.mxu0 %v392_v24  ;;  %v369_v46 = vld [vmem:[#allocation7 + $0x8a8] sm:$0xff]  ;;  %v368_v48 = vld [vmem:[#allocation7 + $0x8a0] sm:$0xff]  ;;  %v214_v24 = vld [vmem:[#allocation7 + $0x3d0] sm:$0xff] }
  0x8e   :  { %799 = vmatpush1.msra.mxu1 %v146_v25  ;;  %662 = vmatprep.subr.mxu0 %v389_v26  ;;  %v365_v50 = vld [vmem:[#allocation7 + $0x888] sm:$0xff]  ;;  %v364_v52 = vld [vmem:[#allocation7 + $0x880] sm:$0xff]  ;;  %v211_v26 = vld [vmem:[#allocation7 + $0x3b8] sm:$0xff] }
  0x8f   :  { %800 = vmatprep.subr.mxu1 %v143_v27  ;;  %663 = vmatpush1.msra.mxu0 %v388_v28  ;;  %v361_v54 = vld [vmem:[#allocation7 + $0x868] sm:$0xff]  ;;  %v360_v56 = vld [vmem:[#allocation7 + $0x860] sm:$0xff]  ;;  %v210_v28 = vld [vmem:[#allocation7 + $0x3b0] sm:$0xff] }
  0x90   :  { %801 = vmatpush1.msra.mxu1 %v142_v29  ;;  %664 = vmatprep.subr.mxu0 %v385_v30  ;;  %v357_v58 = vld [vmem:[#allocation7 + $0x848] sm:$0xff]  ;;  %v356_v60 = vld [vmem:[#allocation7 + $0x840] sm:$0xff]  ;;  %v207_v30 = vld [vmem:[#allocation7 + $0x398] sm:$0xff] }
  0x91   :  { %802 = vmatprep.subr.mxu1 %v139_v31  ;;  %665 = vmatpush1.msra.mxu0 %v384_v32  ;;  %v353_v62 = vld [vmem:[#allocation7 + $0x828] sm:$0xff]  ;;  %v352_v1 = vld [vmem:[#allocation7 + $0x820] sm:$0xff]  ;;  %v206_v32 = vld [vmem:[#allocation7 + $0x390] sm:$0xff] }
  0x92   :  { %803 = vmatpush1.msra.mxu1 %v138_v33  ;;  %666 = vmatprep.subr.mxu0 %v381_v34  ;;  %v349_v4 = vld [vmem:[#allocation7 + $0x808] sm:$0xff]  ;;  %v348_v6 = vld [vmem:[#allocation7 + $0x800] sm:$0xff]  ;;  %v203_v34 = vld [vmem:[#allocation7 + $0x378] sm:$0xff] }
  0x93   :  { %804 = vmatprep.subr.mxu1 %v135_v35  ;;  %667 = vmatpush1.msra.mxu0 %v380_v36  ;;  %v473_v8 = vld [vmem:[#allocation7 + $0xbe8] sm:$0xff]  ;;  %v472_v10 = vld [vmem:[#allocation7 + $0xbe0] sm:$0xff]  ;;  %v202_v36 = vld [vmem:[#allocation7 + $0x370] sm:$0xff] }
  0x94   :  { %805 = vmatpush1.msra.mxu1 %v134_v37  ;;  %668 = vmatprep.subr.mxu0 %v377_v38  ;;  %v469_v12 = vld [vmem:[#allocation7 + $0xbc8] sm:$0xff]  ;;  %v468_v14 = vld [vmem:[#allocation7 + $0xbc0] sm:$0xff]  ;;  %v199_v38 = vld [vmem:[#allocation7 + $0x358] sm:$0xff] }
  0x95   :  { %806 = vmatprep.subr.mxu1 %v131_v39  ;;  %669 = vmatpush1.msra.mxu0 %v376_v40  ;;  %v465_v16 = vld [vmem:[#allocation7 + $0xba8] sm:$0xff]  ;;  %v464_v19 = vld [vmem:[#allocation7 + $0xba0] sm:$0xff]  ;;  %v198_v40 = vld [vmem:[#allocation7 + $0x350] sm:$0xff] }
  0x96   :  { %807 = vmatpush1.msra.mxu1 %v130_v41  ;;  %670 = vmatprep.subr.mxu0 %v373_v42  ;;  %v461_v21 = vld [vmem:[#allocation7 + $0xb88] sm:$0xff]  ;;  %v460_v23 = vld [vmem:[#allocation7 + $0xb80] sm:$0xff]  ;;  %v195_v42 = vld [vmem:[#allocation7 + $0x338] sm:$0xff] }
  0x97   :  { %808 = vmatprep.subr.mxu1 %v127_v43  ;;  %671 = vmatpush1.msra.mxu0 %v372_v44  ;;  %v457_v25 = vld [vmem:[#allocation7 + $0xb68] sm:$0xff]  ;;  %v456_v27 = vld [vmem:[#allocation7 + $0xb60] sm:$0xff]  ;;  %v194_v44 = vld [vmem:[#allocation7 + $0x330] sm:$0xff] }
  0x98   :  { %809 = vmatpush1.msra.mxu1 %v126_v45  ;;  %672 = vmatprep.subr.mxu0 %v369_v46  ;;  %v453_v29 = vld [vmem:[#allocation7 + $0xb48] sm:$0xff]  ;;  %v452_v31 = vld [vmem:[#allocation7 + $0xb40] sm:$0xff]  ;;  %v191_v46 = vld [vmem:[#allocation7 + $0x318] sm:$0xff] }
  0x99   :  { %810 = vmatprep.subr.mxu1 %v123_v47  ;;  %673 = vmatpush1.msra.mxu0 %v368_v48  ;;  %v449_v33 = vld [vmem:[#allocation7 + $0xb28] sm:$0xff]  ;;  %v448_v35 = vld [vmem:[#allocation7 + $0xb20] sm:$0xff]  ;;  %v190_v48 = vld [vmem:[#allocation7 + $0x310] sm:$0xff] }
  0x9a   :  { %811 = vmatpush1.msra.mxu1 %v122_v49  ;;  %674 = vmatprep.subr.mxu0 %v365_v50  ;;  %v445_v37 = vld [vmem:[#allocation7 + $0xb08] sm:$0xff]  ;;  %v444_v39 = vld [vmem:[#allocation7 + $0xb00] sm:$0xff]  ;;  %v187_v50 = vld [vmem:[#allocation7 + $0x2f8] sm:$0xff] }
  0x9b   :  { %812 = vmatprep.subr.mxu1 %v119_v51  ;;  %675 = vmatpush1.msra.mxu0 %v364_v52  ;;  %v441_v41 = vld [vmem:[#allocation7 + $0xae8] sm:$0xff]  ;;  %v440_v43 = vld [vmem:[#allocation7 + $0xae0] sm:$0xff]  ;;  %v186_v52 = vld [vmem:[#allocation7 + $0x2f0] sm:$0xff] }
  0x9c   :  { %813 = vmatpush1.msra.mxu1 %v118_v53  ;;  %676 = vmatprep.subr.mxu0 %v361_v54  ;;  %v437_v45 = vld [vmem:[#allocation7 + $0xac8] sm:$0xff]  ;;  %v436_v47 = vld [vmem:[#allocation7 + $0xac0] sm:$0xff]  ;;  %v183_v54 = vld [vmem:[#allocation7 + $0x2d8] sm:$0xff] }
  0x9d   :  { %814 = vmatprep.subr.mxu1 %v115_v55  ;;  %677 = vmatpush1.msra.mxu0 %v360_v56  ;;  %v433_v49 = vld [vmem:[#allocation7 + $0xaa8] sm:$0xff]  ;;  %v432_v51 = vld [vmem:[#allocation7 + $0xaa0] sm:$0xff]  ;;  %v182_v56 = vld [vmem:[#allocation7 + $0x2d0] sm:$0xff] }
  0x9e   :  { %815 = vmatpush1.msra.mxu1 %v114_v57  ;;  %678 = vmatprep.subr.mxu0 %v357_v58  ;;  %v429_v53 = vld [vmem:[#allocation7 + $0xa88] sm:$0xff]  ;;  %v428_v55 = vld [vmem:[#allocation7 + $0xa80] sm:$0xff]  ;;  %v179_v58 = vld [vmem:[#allocation7 + $0x2b8] sm:$0xff] }
  0x9f   :  { %816 = vmatprep.subr.mxu1 %v111_v59  ;;  %679 = vmatpush1.msra.mxu0 %v356_v60  ;;  %v425_v57 = vld [vmem:[#allocation7 + $0xa68] sm:$0xff]  ;;  %v424_v59 = vld [vmem:[#allocation7 + $0xa60] sm:$0xff]  ;;  %v178_v60 = vld [vmem:[#allocation7 + $0x2b0] sm:$0xff] }
  0xa0   :  { %817 = vmatpush1.msra.mxu1 %v110_v61  ;;  %680 = vmatprep.subr.mxu0 %v353_v62  ;;  %v421_v61 = vld [vmem:[#allocation7 + $0xa48] sm:$0xff]  ;;  %v175_v62 = vld [vmem:[#allocation7 + $0x298] sm:$0xff] }
  0xa1   :  { %818 = vmatprep.subr.mxu1 %v107_v0  ;;  %681 = vmatpush1.msra.mxu0 %v352_v1  ;;  %v420_v0 = vld [vmem:[#allocation7 + $0xa40] sm:$0xff]  ;;  %v174_v1 = vld [vmem:[#allocation7 + $0x290] sm:$0xff] }
  0xa2   :  { %819 = vmatpush1.msra.mxu1 %v106_v3  ;;  %682 = vmatprep.subr.mxu0 %v349_v4  ;;  %v417_v3 = vld [vmem:[#allocation7 + $0xa28] sm:$0xff]  ;;  %v171_v4 = vld [vmem:[#allocation7 + $0x278] sm:$0xff] }
  0xa3   :  { %820 = vmatprep.subr.mxu1 %v103_v5  ;;  %683 = vmatpush1.msra.mxu0 %v348_v6  ;;  %v416_v5 = vld [vmem:[#allocation7 + $0xa20] sm:$0xff]  ;;  %v170_v6 = vld [vmem:[#allocation7 + $0x270] sm:$0xff] }
  0xa4   :  { %821 = vmatpush1.msra.mxu1 %v102_v7  ;;  %684 = vmatprep.subr.mxu0 %v473_v8  ;;  %v413_v7 = vld [vmem:[#allocation7 + $0xa08] sm:$0xff]  ;;  %v167_v8 = vld [vmem:[#allocation7 + $0x258] sm:$0xff] }
  0xa5   :  { %822 = vmatprep.subr.mxu1 %v99_v9  ;;  %685 = vmatpush2.msra.mxu0 %v472_v10  ;;  %v412_v9 = vld [vmem:[#allocation7 + $0xa00] sm:$0xff]  ;;  %v1672_v10 = vld [vmem:[#allocation4 + $0x28] sm:$0xff] }
  0xa6   :  { %823 = vmatpush1.msra.mxu1 %v98_v11  ;;  %686 = vmatprep.subr.mxu0 %v469_v12  ;;  %v166_v11 = vld [vmem:[#allocation7 + $0x250] sm:$0xff]  ;;  %v1674_v12 = vld [vmem:[#allocation4 + $0x20] sm:$0xff] }
  0xa7   :  { %824 = vmatprep.subr.mxu1 %v95_v13  ;;  %687 = vmatpush2.msra.mxu0 %v468_v14  ;;  %v163_v13 = vld [vmem:[#allocation7 + $0x238] sm:$0xff] }
  0xa8   :  { %825 = vmatpush1.msra.mxu1 %v94_v15  ;;  %688 = vmatprep.subr.mxu0 %v465_v16  ;;  %v283_v14 = vld [vmem:[#allocation7 + $0x5f8] sm:$0xff]  ;;  %v162_v15 = vld [vmem:[#allocation7 + $0x230] sm:$0xff] }
  0xa9   :  { %826 = vmatprep.subr.mxu1 %v219_v18  ;;  %689 = vmatpush2.msra.mxu0 %v464_v19  ;;  %v282_v16 = vld [vmem:[#allocation7 + $0x5f0] sm:$0xff]  ;;  %v159_v18 = vld [vmem:[#allocation7 + $0x218] sm:$0xff] }
  0xaa   :  { %827 = vmatpush2.msra.mxu1 %v218_v20  ;;  %690 = vmatprep.subr.mxu0 %v461_v21  ;;  %v279_v19 = vld [vmem:[#allocation7 + $0x5d8] sm:$0xff]  ;;  %v158_v20 = vld [vmem:[#allocation7 + $0x210] sm:$0xff] }
  0xab   :  { %828 = vmatprep.subr.mxu1 %v215_v22  ;;  %691 = vmatpush2.msra.mxu0 %v460_v23  ;;  %v278_v21 = vld [vmem:[#allocation7 + $0x5d0] sm:$0xff]  ;;  %v275_v22 = vld [vmem:[#allocation7 + $0x5b8] sm:$0xff] }
  0xac   :  { %829 = vmatpush2.msra.mxu1 %v214_v24  ;;  %692 = vmatprep.subr.mxu0 %v457_v25  ;;  %v411_v23 = vld [vmem:[#allocation7 + $0x9f8] sm:$0xff]  ;;  %v274_v24 = vld [vmem:[#allocation7 + $0x5b0] sm:$0xff] }
  0xad   :  { %830 = vmatprep.subr.mxu1 %v211_v26  ;;  %693 = vmatpush2.msra.mxu0 %v456_v27  ;;  %v410_v25 = vld [vmem:[#allocation7 + $0x9f0] sm:$0xff]  ;;  %v271_v26 = vld [vmem:[#allocation7 + $0x598] sm:$0xff] }
  0xae   :  { %831 = vmatpush2.msra.mxu1 %v210_v28  ;;  %694 = vmatprep.subr.mxu0 %v453_v29  ;;  %v407_v27 = vld [vmem:[#allocation7 + $0x9d8] sm:$0xff]  ;;  %v270_v28 = vld [vmem:[#allocation7 + $0x590] sm:$0xff] }
  0xaf   :  { %832 = vmatprep.subr.mxu1 %v207_v30  ;;  %695 = vmatpush2.msra.mxu0 %v452_v31  ;;  %v406_v29 = vld [vmem:[#allocation7 + $0x9d0] sm:$0xff]  ;;  %v267_v30 = vld [vmem:[#allocation7 + $0x578] sm:$0xff] }
  0xb0   :  { %833 = vmatpush2.msra.mxu1 %v206_v32  ;;  %696 = vmatprep.subr.mxu0 %v449_v33  ;;  %v403_v31 = vld [vmem:[#allocation7 + $0x9b8] sm:$0xff]  ;;  %v266_v32 = vld [vmem:[#allocation7 + $0x570] sm:$0xff] }
  0xb1   :  { %834 = vmatprep.subr.mxu1 %v203_v34  ;;  %697 = vmatpush2.msra.mxu0 %v448_v35  ;;  %v402_v33 = vld [vmem:[#allocation7 + $0x9b0] sm:$0xff]  ;;  %v399_v34 = vld [vmem:[#allocation7 + $0x998] sm:$0xff] }
  0xb2   :  { %835 = vmatpush2.msra.mxu1 %v202_v36  ;;  %698 = vmatprep.subr.mxu0 %v445_v37  ;;  %v398_v35 = vld [vmem:[#allocation7 + $0x990] sm:$0xff]  ;;  %v259_v36 = vld [vmem:[#allocation7 + $0x538] sm:$0xff] }
  0xb3   :  { %836 = vmatprep.subr.mxu1 %v199_v38  ;;  %699 = vmatpush2.msra.mxu0 %v444_v39  ;;  %v395_v37 = vld [vmem:[#allocation7 + $0x978] sm:$0xff]  ;;  %v258_v38 = vld [vmem:[#allocation7 + $0x530] sm:$0xff] }
  0xb4   :  { %837 = vmatpush2.msra.mxu1 %v198_v40  ;;  %700 = vmatprep.subr.mxu0 %v441_v41  ;;  %v394_v39 = vld [vmem:[#allocation7 + $0x970] sm:$0xff]  ;;  %v255_v40 = vld [vmem:[#allocation7 + $0x518] sm:$0xff] }
  0xb5   :  { %838 = vmatprep.subr.mxu1 %v195_v42  ;;  %701 = vmatpush2.msra.mxu0 %v440_v43  ;;  %v391_v41 = vld [vmem:[#allocation7 + $0x958] sm:$0xff]  ;;  %v254_v42 = vld [vmem:[#allocation7 + $0x510] sm:$0xff] }
  0xb6   :  { %839 = vmatpush2.msra.mxu1 %v194_v44  ;;  %702 = vmatprep.subr.mxu0 %v437_v45  ;;  %v390_v43 = vld [vmem:[#allocation7 + $0x950] sm:$0xff]  ;;  %v251_v44 = vld [vmem:[#allocation7 + $0x4f8] sm:$0xff] }
  0xb7   :  { %840 = vmatprep.subr.mxu1 %v191_v46  ;;  %703 = vmatpush2.msra.mxu0 %v436_v47  ;;  %v387_v45 = vld [vmem:[#allocation7 + $0x938] sm:$0xff]  ;;  %v250_v46 = vld [vmem:[#allocation7 + $0x4f0] sm:$0xff] }
  0xb8   :  { %841 = vmatpush2.msra.mxu1 %v190_v48  ;;  %704 = vmatprep.subr.mxu0 %v433_v49  ;;  %v386_v47 = vld [vmem:[#allocation7 + $0x930] sm:$0xff]  ;;  %v247_v48 = vld [vmem:[#allocation7 + $0x4d8] sm:$0xff] }
  0xb9   :  { %842 = vmatprep.subr.mxu1 %v187_v50  ;;  %705 = vmatpush2.msra.mxu0 %v432_v51  ;;  %v383_v49 = vld [vmem:[#allocation7 + $0x918] sm:$0xff]  ;;  %v246_v50 = vld [vmem:[#allocation7 + $0x4d0] sm:$0xff] }
  0xba   :  { %843 = vmatpush2.msra.mxu1 %v186_v52  ;;  %706 = vmatprep.subr.mxu0 %v429_v53  ;;  %v382_v51 = vld [vmem:[#allocation7 + $0x910] sm:$0xff]  ;;  %v243_v52 = vld [vmem:[#allocation7 + $0x4b8] sm:$0xff] }
  0xbb   :  { %844 = vmatprep.subr.mxu1 %v183_v54  ;;  %707 = vmatpush2.msra.mxu0 %v428_v55  ;;  %v379_v53 = vld [vmem:[#allocation7 + $0x8f8] sm:$0xff]  ;;  %v242_v54 = vld [vmem:[#allocation7 + $0x4b0] sm:$0xff] }
  0xbc   :  { %845 = vmatpush2.msra.mxu1 %v182_v56  ;;  %708 = vmatprep.subr.mxu0 %v425_v57  ;;  %v378_v55 = vld [vmem:[#allocation7 + $0x8f0] sm:$0xff]  ;;  %v239_v56 = vld [vmem:[#allocation7 + $0x498] sm:$0xff] }
  0xbd   :  { %846 = vmatprep.subr.mxu1 %v179_v58  ;;  %709 = vmatpush2.msra.mxu0 %v424_v59  ;;  %v375_v57 = vld [vmem:[#allocation7 + $0x8d8] sm:$0xff]  ;;  %v238_v58 = vld [vmem:[#allocation7 + $0x490] sm:$0xff] }
  0xbe   :  { %847 = vmatpush2.msra.mxu1 %v178_v60  ;;  %710 = vmatprep.subr.mxu0 %v421_v61  ;;  %v374_v59 = vld [vmem:[#allocation7 + $0x8d0] sm:$0xff]  ;;  %v235_v60 = vld [vmem:[#allocation7 + $0x478] sm:$0xff] }
  0xbf   :  { %848 = vmatprep.subr.mxu1 %v175_v62  ;;  %711 = vmatpush2.msra.mxu0 %v420_v0  ;;  %v371_v61 = vld [vmem:[#allocation7 + $0x8b8] sm:$0xff]  ;;  %v234_v62 = vld [vmem:[#allocation7 + $0x470] sm:$0xff] }
  0xc0   :  { %849 = vmatpush2.msra.mxu1 %v174_v1  ;;  %712 = vmatprep.subr.mxu0 %v417_v3  ;;  %v370_v0 = vld [vmem:[#allocation7 + $0x8b0] sm:$0xff]  ;;  %v231_v1 = vld [vmem:[#allocation7 + $0x458] sm:$0xff] }
  0xc1   :  { %850 = vmatprep.subr.mxu1 %v171_v4  ;;  %713 = vmatpush2.msra.mxu0 %v416_v5  ;;  %v367_v3 = vld [vmem:[#allocation7 + $0x898] sm:$0xff]  ;;  %v230_v4 = vld [vmem:[#allocation7 + $0x450] sm:$0xff] }
  0xc2   :  { %851 = vmatpush2.msra.mxu1 %v170_v6  ;;  %714 = vmatprep.subr.mxu0 %v413_v7  ;;  %v366_v5 = vld [vmem:[#allocation7 + $0x890] sm:$0xff]  ;;  %v227_v6 = vld [vmem:[#allocation7 + $0x438] sm:$0xff] }
  0xc3   :  { %852 = vmatprep.subr.mxu1 %v167_v8  ;;  %715 = vmatpush2.msra.mxu0 %v412_v9  ;;  %v363_v7 = vld [vmem:[#allocation7 + $0x878] sm:$0xff]  ;;  %v226_v8 = vld [vmem:[#allocation7 + $0x430] sm:$0xff] }
  0xc4   :  { %716 = vmatprep.mubr.f32.mxu0 %v1672_v10  ;;  %853 = vmatpush2.msra.mxu1 %v166_v11  ;;  %v362_v9 = vld [vmem:[#allocation7 + $0x870] sm:$0xff]  ;;  %v223_v11 = vld [vmem:[#allocation7 + $0x418] sm:$0xff] }
  0xc5   :  { %717 = vmatmul.mubr.f32.vlgmr.msra.gmra.mxu0 %v1674_v12  ;;  %854 = vmatprep.subr.mxu1 %v163_v13  ;;  %v359_v13 = vld [vmem:[#allocation7 + $0x858] sm:$0xff] }
  0xc6   :  { %865 = vmatprep.subr.mxu0 %v283_v14  ;;  %855 = vmatpush2.msra.mxu1 %v162_v15  ;;  %v222_v14 = vld [vmem:[#allocation7 + $0x410] sm:$0xff] }
  0xc7   :  { %866 = vmatpush1.msra.mxu0 %v282_v16  ;;  %856 = vmatprep.subr.mxu1 %v159_v18  ;;  %v358_v15 = vld [vmem:[#allocation7 + $0x850] sm:$0xff]  ;;  %v347_v16 = vld [vmem:[#allocation7 + $0x7f8] sm:$0xff] }
  0xc8   :  { %867 = vmatprep.subr.mxu0 %v279_v19  ;;  %857 = vmatpush2.msra.mxu1 %v158_v20  ;;  %v355_v18 = vld [vmem:[#allocation7 + $0x838] sm:$0xff]  ;;  %v346_v19 = vld [vmem:[#allocation7 + $0x7f0] sm:$0xff] }
  0xc9   :  { %858 = vmatprep.mubr.f32.mxu1 %v1664_v63  ;;  %868 = vmatpush1.msra.mxu0 %v278_v21  ;;  %v263_v63 = vld [vmem:[#allocation7 + $0x558] sm:$0xff]  ;;  %v354_v20 = vld [vmem:[#allocation7 + $0x830] sm:$0xff] }
  0xca   :  { %859 = vmatmul.mubr.f32.vlgmr.msra.gmra.mxu1 %v1666_v2  ;;  %869 = vmatprep.subr.mxu0 %v275_v22  ;;  %v262_v2 = vld [vmem:[#allocation7 + $0x550] sm:$0xff]  ;;  %v343_v21 = vld [vmem:[#allocation7 + $0x7d8] sm:$0xff] }
  0xcb   :  { %936 = vmatprep.subr.mxu1 %v411_v23  ;;  %870 = vmatpush1.msra.mxu0 %v274_v24  ;;  %v351_v22 = vld [vmem:[#allocation7 + $0x818] sm:$0xff]  ;;  %v342_v23 = vld [vmem:[#allocation7 + $0x7d0] sm:$0xff] }
  0xcc   :  { %937 = vmatpush1.msra.mxu1 %v410_v25  ;;  %871 = vmatprep.subr.mxu0 %v271_v26  ;;  %v350_v24 = vld [vmem:[#allocation7 + $0x810] sm:$0xff]  ;;  %v339_v25 = vld [vmem:[#allocation7 + $0x7b8] sm:$0xff] }
  0xcd   :  { %938 = vmatprep.subr.mxu1 %v407_v27  ;;  %872 = vmatpush1.msra.mxu0 %v270_v28  ;;  %v475_v26 = vld [vmem:[#allocation7 + $0xbf8] sm:$0xff]  ;;  %v338_v27 = vld [vmem:[#allocation7 + $0x7b0] sm:$0xff] }
  0xce   :  { %939 = vmatpush1.msra.mxu1 %v406_v29  ;;  %873 = vmatprep.subr.mxu0 %v267_v30  ;;  %v474_v28 = vld [vmem:[#allocation7 + $0xbf0] sm:$0xff]  ;;  %v335_v29 = vld [vmem:[#allocation7 + $0x798] sm:$0xff] }
  0xcf   :  { %940 = vmatprep.subr.mxu1 %v403_v31  ;;  %874 = vmatpush1.msra.mxu0 %v266_v32  ;;  %v471_v30 = vld [vmem:[#allocation7 + $0xbd8] sm:$0xff]  ;;  %v334_v31 = vld [vmem:[#allocation7 + $0x790] sm:$0xff] }
  0xd0   :  { %941 = vmatpush1.msra.mxu1 %v402_v33  ;;  %875 = vmatprep.subr.mxu0 %v263_v63  ;;  %v470_v32 = vld [vmem:[#allocation7 + $0xbd0] sm:$0xff]  ;;  %v331_v33 = vld [vmem:[#allocation7 + $0x778] sm:$0xff] }
  0xd1   :  { %942 = vmatprep.subr.mxu1 %v399_v34  ;;  %876 = vmatpush1.msra.mxu0 %v262_v2  ;;  %v467_v63 = vld [vmem:[#allocation7 + $0xbb8] sm:$0xff]  ;;  %v330_v34 = vld [vmem:[#allocation7 + $0x770] sm:$0xff] }
  0xd2   :  { %943 = vmatpush1.msra.mxu1 %v398_v35  ;;  %877 = vmatprep.subr.mxu0 %v259_v36  ;;  %v466_v2 = vld [vmem:[#allocation7 + $0xbb0] sm:$0xff]  ;;  %v327_v35 = vld [vmem:[#allocation7 + $0x758] sm:$0xff] }
  0xd3   :  { %944 = vmatprep.subr.mxu1 %v395_v37  ;;  %878 = vmatpush1.msra.mxu0 %v258_v38  ;;  %v463_v36 = vld [vmem:[#allocation7 + $0xb98] sm:$0xff]  ;;  %v326_v37 = vld [vmem:[#allocation7 + $0x750] sm:$0xff] }
  0xd4   :  { %945 = vmatpush1.msra.mxu1 %v394_v39  ;;  %879 = vmatprep.subr.mxu0 %v255_v40  ;;  %v462_v38 = vld [vmem:[#allocation7 + $0xb90] sm:$0xff]  ;;  %v323_v39 = vld [vmem:[#allocation7 + $0x738] sm:$0xff] }
  0xd5   :  { %946 = vmatprep.subr.mxu1 %v391_v41  ;;  %880 = vmatpush1.msra.mxu0 %v254_v42  ;;  %v459_v40 = vld [vmem:[#allocation7 + $0xb78] sm:$0xff]  ;;  %v322_v41 = vld [vmem:[#allocation7 + $0x730] sm:$0xff] }
  0xd6   :  { %947 = vmatpush1.msra.mxu1 %v390_v43  ;;  %881 = vmatprep.subr.mxu0 %v251_v44  ;;  %v458_v42 = vld [vmem:[#allocation7 + $0xb70] sm:$0xff]  ;;  %v319_v43 = vld [vmem:[#allocation7 + $0x718] sm:$0xff] }
  0xd7   :  { %948 = vmatprep.subr.mxu1 %v387_v45  ;;  %882 = vmatpush1.msra.mxu0 %v250_v46  ;;  %v455_v44 = vld [vmem:[#allocation7 + $0xb58] sm:$0xff]  ;;  %v318_v45 = vld [vmem:[#allocation7 + $0x710] sm:$0xff] }
  0xd8   :  { %949 = vmatpush1.msra.mxu1 %v386_v47  ;;  %883 = vmatprep.subr.mxu0 %v247_v48  ;;  %v454_v46 = vld [vmem:[#allocation7 + $0xb50] sm:$0xff]  ;;  %v315_v47 = vld [vmem:[#allocation7 + $0x6f8] sm:$0xff] }
  0xd9   :  { %950 = vmatprep.subr.mxu1 %v383_v49  ;;  %884 = vmatpush1.msra.mxu0 %v246_v50  ;;  %v451_v48 = vld [vmem:[#allocation7 + $0xb38] sm:$0xff]  ;;  %v314_v49 = vld [vmem:[#allocation7 + $0x6f0] sm:$0xff] }
  0xda   :  { %951 = vmatpush1.msra.mxu1 %v382_v51  ;;  %885 = vmatprep.subr.mxu0 %v243_v52  ;;  %v450_v50 = vld [vmem:[#allocation7 + $0xb30] sm:$0xff]  ;;  %v311_v51 = vld [vmem:[#allocation7 + $0x6d8] sm:$0xff] }
  0xdb   :  { %952 = vmatprep.subr.mxu1 %v379_v53  ;;  %886 = vmatpush1.msra.mxu0 %v242_v54  ;;  %v447_v52 = vld [vmem:[#allocation7 + $0xb18] sm:$0xff]  ;;  %v310_v53 = vld [vmem:[#allocation7 + $0x6d0] sm:$0xff] }
  0xdc   :  { %953 = vmatpush1.msra.mxu1 %v378_v55  ;;  %887 = vmatprep.subr.mxu0 %v239_v56  ;;  %v446_v54 = vld [vmem:[#allocation7 + $0xb10] sm:$0xff]  ;;  %v307_v55 = vld [vmem:[#allocation7 + $0x6b8] sm:$0xff] }
  0xdd   :  { %954 = vmatprep.subr.mxu1 %v375_v57  ;;  %888 = vmatpush1.msra.mxu0 %v238_v58  ;;  %v443_v56 = vld [vmem:[#allocation7 + $0xaf8] sm:$0xff]  ;;  %v306_v57 = vld [vmem:[#allocation7 + $0x6b0] sm:$0xff] }
  0xde   :  { %955 = vmatpush1.msra.mxu1 %v374_v59  ;;  %889 = vmatprep.subr.mxu0 %v235_v60  ;;  %v442_v58 = vld [vmem:[#allocation7 + $0xaf0] sm:$0xff]  ;;  %v303_v59 = vld [vmem:[#allocation7 + $0x698] sm:$0xff] }
  0xdf   :  { %956 = vmatprep.subr.mxu1 %v371_v61  ;;  %890 = vmatpush1.msra.mxu0 %v234_v62  ;;  %v439_v60 = vld [vmem:[#allocation7 + $0xad8] sm:$0xff]  ;;  %v302_v61 = vld [vmem:[#allocation7 + $0x690] sm:$0xff] }
  0xe0   :  { %957 = vmatpush1.msra.mxu1 %v370_v0  ;;  %891 = vmatprep.subr.mxu0 %v231_v1  ;;  %v438_v62 = vld [vmem:[#allocation7 + $0xad0] sm:$0xff]  ;;  %v299_v0 = vld [vmem:[#allocation7 + $0x678] sm:$0xff] }
  0xe1   :  { %958 = vmatprep.subr.mxu1 %v367_v3  ;;  %892 = vmatpush1.msra.mxu0 %v230_v4  ;;  %v435_v1 = vld [vmem:[#allocation7 + $0xab8] sm:$0xff]  ;;  %v298_v3 = vld [vmem:[#allocation7 + $0x670] sm:$0xff] }
  0xe2   :  { %959 = vmatpush1.msra.mxu1 %v366_v5  ;;  %893 = vmatprep.subr.mxu0 %v227_v6  ;;  %v434_v4 = vld [vmem:[#allocation7 + $0xab0] sm:$0xff]  ;;  %v295_v5 = vld [vmem:[#allocation7 + $0x658] sm:$0xff] }
  0xe3   :  { %960 = vmatprep.subr.mxu1 %v363_v7  ;;  %894 = vmatpush1.msra.mxu0 %v226_v8  ;;  %v431_v6 = vld [vmem:[#allocation7 + $0xa98] sm:$0xff]  ;;  %v294_v7 = vld [vmem:[#allocation7 + $0x650] sm:$0xff] }
  0xe4   :  { %961 = vmatpush1.msra.mxu1 %v362_v9  ;;  %895 = vmatprep.subr.mxu0 %v223_v11  ;;  %v430_v8 = vld [vmem:[#allocation7 + $0xa90] sm:$0xff]  ;;  %v291_v9 = vld [vmem:[#allocation7 + $0x638] sm:$0xff] }
  0xe5   :  { %962 = vmatprep.subr.mxu1 %v359_v13  ;;  %896 = vmatpush1.msra.mxu0 %v222_v14  ;;  %v427_v11 = vld [vmem:[#allocation7 + $0xa78] sm:$0xff]  ;;  %v290_v13 = vld [vmem:[#allocation7 + $0x630] sm:$0xff] }
  0xe6   :  { %963 = vmatpush1.msra.mxu1 %v358_v15  ;;  %897 = vmatprep.subr.mxu0 %v347_v16  ;;  %v426_v14 = vld [vmem:[#allocation7 + $0xa70] sm:$0xff]  ;;  %v287_v15 = vld [vmem:[#allocation7 + $0x618] sm:$0xff] }
  0xe7   :  { %964 = vmatprep.subr.mxu1 %v355_v18  ;;  %898 = vmatpush2.msra.mxu0 %v346_v19  ;;  %v423_v16 = vld [vmem:[#allocation7 + $0xa58] sm:$0xff]  ;;  %v286_v18 = vld [vmem:[#allocation7 + $0x610] sm:$0xff] }
  0xe8   :  { %965 = vmatpush1.msra.mxu1 %v354_v20  ;;  %899 = vmatprep.subr.mxu0 %v343_v21  ;;  %v422_v19 = vld [vmem:[#allocation7 + $0xa50] sm:$0xff]  ;;  %v419_v20 = vld [vmem:[#allocation7 + $0xa38] sm:$0xff] }
  0xe9   :  { %966 = vmatprep.subr.mxu1 %v351_v22  ;;  %900 = vmatpush2.msra.mxu0 %v342_v23  ;;  %v483_v21 = vld [vmem:[#allocation7 + $0xc38] sm:$0xff]  ;;  %v1472_v22 = vld [vmem:[#allocation4 + $0x18] sm:$0xff]  ;;  %v418_v23 = vld [vmem:[#allocation7 + $0xa30] sm:$0xff] }
  0xea   :  { %967 = vmatpush1.msra.mxu1 %v350_v24  ;;  %901 = vmatprep.subr.mxu0 %v339_v25  ;;  %v482_v24 = vld [vmem:[#allocation7 + $0xc30] sm:$0xff]  ;;  %v1473_v25 = vld [vmem:[#allocation4 + $0x10] sm:$0xff] }
  0xeb   :  { %968 = vmatprep.subr.mxu1 %v475_v26  ;;  %902 = vmatpush2.msra.mxu0 %v338_v27  ;;  %v415_v26 = vld [vmem:[#allocation7 + $0xa18] sm:$0xff] }
  0xec   :  { %969 = vmatpush2.msra.mxu1 %v474_v28  ;;  %903 = vmatprep.subr.mxu0 %v335_v29  ;;  %v479_v27 = vld [vmem:[#allocation7 + $0xc18] sm:$0xff]  ;;  %v414_v28 = vld [vmem:[#allocation7 + $0xa10] sm:$0xff] }
  0xed   :  { %970 = vmatprep.subr.mxu1 %v471_v30  ;;  %904 = vmatpush2.msra.mxu0 %v334_v31  ;;  %v478_v29 = vld [vmem:[#allocation7 + $0xc10] sm:$0xff]  ;;  %v1186_v30 = vld [vmem:[#allocation10 + $0xf8] sm:$0xff] }
  0xee   :  { %971 = vmatpush2.msra.mxu1 %v470_v32  ;;  %905 = vmatprep.subr.mxu0 %v331_v33  ;;  %v1170_v31 = vld [vmem:[#allocation10 + $0x78] sm:$0xff]  ;;  %v1185_v33 = vld [vmem:[#allocation10 + $0xf0] sm:$0xff] }
  0xef   :  { %972 = vmatprep.subr.mxu1 %v467_v63  ;;  %906 = vmatpush2.msra.mxu0 %v330_v34  ;;  %v1474_v32 = vld [vmem:[#allocation4 + $0x30] sm:$0xff]  ;;  %v1184_v34 = vld [vmem:[#allocation10 + $0xe8] sm:$0xff] }
  0xf0   :  { %973 = vmatpush2.msra.mxu1 %v466_v2  ;;  %907 = vmatprep.subr.mxu0 %v327_v35  ;;  %v1169_v63 = vld [vmem:[#allocation10 + $0x70] sm:$0xff]  ;;  %v1168_v2 = vld [vmem:[#allocation10 + $0x68] sm:$0xff]  ;;  %v1183_v35 = vld [vmem:[#allocation10 + $0xe0] sm:$0xff] }
  0xf1   :  { %974 = vmatprep.subr.mxu1 %v463_v36  ;;  %908 = vmatpush2.msra.mxu0 %v326_v37  ;;  %v1202_v36 = vld [vmem:[#allocation10 + $0x178] sm:$0xff]  ;;  %v1217_v37 = vld [vmem:[#allocation10 + $0x1f0] sm:$0xff] }
  0xf2   :  { %975 = vmatpush2.msra.mxu1 %v462_v38  ;;  %909 = vmatprep.subr.mxu0 %v323_v39  ;;  %v1201_v38 = vld [vmem:[#allocation10 + $0x170] sm:$0xff]  ;;  %v1216_v39 = vld [vmem:[#allocation10 + $0x1e8] sm:$0xff] }
  0xf3   :  { %976 = vmatprep.subr.mxu1 %v459_v40  ;;  %910 = vmatpush2.msra.mxu0 %v322_v41  ;;  %v1166_v40 = vld [vmem:[#allocation10 + $0x58] sm:$0xff]  ;;  %v1200_v41 = vld [vmem:[#allocation10 + $0x168] sm:$0xff] }
  0xf4   :  { %977 = vmatpush2.msra.mxu1 %v458_v42  ;;  %911 = vmatprep.subr.mxu0 %v319_v43  ;;  %v1181_v42 = vld [vmem:[#allocation10 + $0xd0] sm:$0xff]  ;;  %v1215_v43 = vld [vmem:[#allocation10 + $0x1e0] sm:$0xff] }
  0xf5   :  { %978 = vmatprep.subr.mxu1 %v455_v44  ;;  %912 = vmatpush2.msra.mxu0 %v318_v45  ;;  %v1165_v44 = vld [vmem:[#allocation10 + $0x50] sm:$0xff]  ;;  %v1199_v45 = vld [vmem:[#allocation10 + $0x160] sm:$0xff] }
  0xf6   :  { %979 = vmatpush2.msra.mxu1 %v454_v46  ;;  %913 = vmatprep.subr.mxu0 %v315_v47  ;;  %v1180_v46 = vld [vmem:[#allocation10 + $0xc8] sm:$0xff]  ;;  %v1214_v47 = vld [vmem:[#allocation10 + $0x1d8] sm:$0xff] }
  0xf7   :  { %980 = vmatprep.subr.mxu1 %v451_v48  ;;  %914 = vmatpush2.msra.mxu0 %v314_v49  ;;  %v1164_v48 = vld [vmem:[#allocation10 + $0x48] sm:$0xff]  ;;  %v1198_v49 = vld [vmem:[#allocation10 + $0x158] sm:$0xff] }
  0xf8   :  { %981 = vmatpush2.msra.mxu1 %v450_v50  ;;  %915 = vmatprep.subr.mxu0 %v311_v51  ;;  %v1179_v50 = vld [vmem:[#allocation10 + $0xc0] sm:$0xff]  ;;  %v1213_v51 = vld [vmem:[#allocation10 + $0x1d0] sm:$0xff] }
  0xf9   :  { %982 = vmatprep.subr.mxu1 %v447_v52  ;;  %916 = vmatpush2.msra.mxu0 %v310_v53  ;;  %v1163_v52 = vld [vmem:[#allocation10 + $0x40] sm:$0xff]  ;;  %v1197_v53 = vld [vmem:[#allocation10 + $0x150] sm:$0xff] }
  0xfa   :  { %983 = vmatpush2.msra.mxu1 %v446_v54  ;;  %917 = vmatprep.subr.mxu0 %v307_v55  ;;  %v1178_v54 = vld [vmem:[#allocation10 + $0xb8] sm:$0xff]  ;;  %v1212_v55 = vld [vmem:[#allocation10 + $0x1c8] sm:$0xff] }
  0xfb   :  { %984 = vmatprep.subr.mxu1 %v443_v56  ;;  %918 = vmatpush2.msra.mxu0 %v306_v57  ;;  %v1162_v56 = vld [vmem:[#allocation10 + $0x38] sm:$0xff]  ;;  %v1196_v57 = vld [vmem:[#allocation10 + $0x148] sm:$0xff] }
  0xfc   :  { %985 = vmatpush2.msra.mxu1 %v442_v58  ;;  %919 = vmatprep.subr.mxu0 %v303_v59  ;;  %v1177_v58 = vld [vmem:[#allocation10 + $0xb0] sm:$0xff]  ;;  %v1211_v59 = vld [vmem:[#allocation10 + $0x1c0] sm:$0xff] }
  0xfd   :  { %986 = vmatprep.subr.mxu1 %v439_v60  ;;  %920 = vmatpush2.msra.mxu0 %v302_v61  ;;  %v1161_v60 = vld [vmem:[#allocation10 + $0x30] sm:$0xff]  ;;  %v1195_v61 = vld [vmem:[#allocation10 + $0x140] sm:$0xff] }
  0xfe   :  { %987 = vmatpush2.msra.mxu1 %v438_v62  ;;  %921 = vmatprep.subr.mxu0 %v299_v0  ;;  %v1176_v62 = vld [vmem:[#allocation10 + $0xa8] sm:$0xff] }
  0xff   :  { %988 = vmatprep.subr.mxu1 %v435_v1  ;;  %922 = vmatpush2.msra.mxu0 %v298_v3  ;;  %v1160_v0 = vld [vmem:[#allocation10 + $0x28] sm:$0xff]  ;;  %v1175_v1 = vld [vmem:[#allocation10 + $0xa0] sm:$0xff] }
 0x100   :  { %989 = vmatpush2.msra.mxu1 %v434_v4  ;;  %923 = vmatprep.subr.mxu0 %v295_v5  ;;  %v1159_v3 = vld [vmem:[#allocation10 + $0x20] sm:$0xff]  ;;  %v1174_v4 = vld [vmem:[#allocation10 + $0x98] sm:$0xff] }
 0x101   :  { %990 = vmatprep.subr.mxu1 %v431_v6  ;;  %924 = vmatpush2.msra.mxu0 %v294_v7  ;;  %v1158_v5 = vld [vmem:[#allocation10 + $0x18] sm:$0xff]  ;;  %v1173_v6 = vld [vmem:[#allocation10 + $0x90] sm:$0xff] }
 0x102   :  { %991 = vmatpush2.msra.mxu1 %v430_v8  ;;  %925 = vmatprep.subr.mxu0 %v291_v9  ;;  %v1157_v7 = vld [vmem:[#allocation10 + $0x10] sm:$0xff]  ;;  %v1172_v8 = vld [vmem:[#allocation10 + $0x88] sm:$0xff] }
 0x103   :  { %992 = vmatprep.subr.mxu1 %v427_v11  ;;  %926 = vmatpush2.msra.mxu0 %v290_v13  ;;  %v1156_v9 = vld [vmem:[#allocation10 + $0x8] sm:$0xff]  ;;  %v1171_v11 = vld [vmem:[#allocation10 + $0x80] sm:$0xff] }
 0x104   :  { %993 = vmatpush2.msra.mxu1 %v426_v14  ;;  %927 = vmatprep.subr.mxu0 %v287_v15  ;;  %v1155_v13 = vld [vmem:[#allocation10] sm:$0xff]  ;;  %v1210_v14 = vld [vmem:[#allocation10 + $0x1b8] sm:$0xff] }
 0x105   :  { %994 = vmatprep.subr.mxu1 %v423_v16  ;;  %928 = vmatpush2.msra.mxu0 %v286_v18  ;;  %v1194_v15 = vld [vmem:[#allocation10 + $0x138] sm:$0xff]  ;;  %v1209_v16 = vld [vmem:[#allocation10 + $0x1b0] sm:$0xff] }
 0x106   :  { %929 = vmatprep.mubr.f32.mxu0 %v1472_v22  ;;  %995 = vmatpush2.msra.mxu1 %v422_v19  ;;  %v1193_v18 = vld [vmem:[#allocation10 + $0x130] sm:$0xff]  ;;  %v1208_v19 = vld [vmem:[#allocation10 + $0x1a8] sm:$0xff]  ;;  %v1191_v22 = vld [vmem:[#allocation10 + $0x120] sm:$0xff] }
 0x107   :  { %930 = vmatmul.mubr.f32.vlgmr.msra.gmra.mxu0 %v1473_v25  ;;  %996 = vmatprep.subr.mxu1 %v419_v20  ;;  %v1192_v20 = vld [vmem:[#allocation10 + $0x128] sm:$0xff]  ;;  %v1205_v25 = vld [vmem:[#allocation10 + $0x190] sm:$0xff] }
 0x108   :  { %1035 = vmatprep.subr.mxu0 %v483_v21  ;;  %997 = vmatpush2.msra.mxu1 %v418_v23  ;;  %v1207_v21 = vld [vmem:[#allocation10 + $0x1a0] sm:$0xff]  ;;  %v1206_v23 = vld [vmem:[#allocation10 + $0x198] sm:$0xff] }
 0x109   :  { %1036 = vmatpush1.msra.mxu0 %v482_v24  ;;  %998 = vmatprep.subr.mxu1 %v415_v26  ;;  %v1190_v24 = vld [vmem:[#allocation10 + $0x118] sm:$0xff]  ;;  %v486_v26 = vlaneseq }
 0x10a   :  { %1037 = vmatprep.subr.mxu0 %v479_v27  ;;  %999 = vmatpush2.msra.mxu1 %v414_v28  ;;  %v1189_v27 = vld [vmem:[#allocation10 + $0x110] sm:$0xff]  ;;  %v1204_v28 = vld [vmem:[#allocation10 + $0x188] sm:$0xff] }
 0x10b   :  { %1000 = vmatprep.mubr.f32.mxu1 %v1672_v10  ;;  %1038 = vmatpush1.msra.mxu0 %v478_v29  ;;  %v1218_v10 = vld [vmem:[#allocation10 + $0x1f8] sm:$0xff]  ;;  %v1684_v29 = vand.u32 127, %v486_v26 }
 0x10c   :  { %1071 = vmatprep.mubr.f32.mxu0 %v1612_v17  ;;  %1001 = vmatmul.mubr.f32.vlgmr.msra.gmra.mxu1 %v1674_v12  ;;  %v1167_v17 = vld [vmem:[#allocation10 + $0x60] sm:$0xff]  ;;  %v1182_v12 = vld [vmem:[#allocation10 + $0xd8] sm:$0xff] }
 0x10d   :  { %1385 = vmatmul.mubr.msk.f32.vlgmr.msra.gmra.mxu0 %vm506_vm0, %v1474_v32  ;;  %1391 = vmatprep.subr.mxu0 %v1186_v30  ;;  %v1188_v30 = vld [vmem:[#allocation10 + $0x108] sm:$0xff]  ;;  %v1187_v32 = vld [vmem:[#allocation10 + $0x100] sm:$0xff] }
 0x10e   :  { %1392 = vmatpush3.msra.mxu0 %v1170_v31  ;;  %1426 = vmatprep.subr.mxu1 %v1218_v10  ;;  %v1203_v31 = vld [vmem:[#allocation10 + $0x180] sm:$0xff] }
 0x10f   :  { %1393 = vmatprep.subr.mxu0 %v1185_v33  ;;  %1427 = vmatpush3.msra.mxu1 %v1202_v36  ;;  %v1090_v33 = vadd.s32 128, %v1684_v29  ;;  %v1102_v36 = vstv %s1709_s0  ;;  %s1613_s0 = smov [#allocation13]  }
 0x110   :  { %1394 = vmatpush3.msra.mxu0 %v1169_v63  ;;  %1428 = vmatprep.subr.mxu1 %v1217_v37  ;;  %v1687_v63 = vshrl.u32 %v486_v26, 7  ;;  %s1373_s24 = sshll.u32 %s1613_s0, 4  ;;  %s1374_s24 = int_to_ptr.vmem [resolvable:$true] %s1373_s24 }
 0x111   :  { %1395 = vmatprep.subr.mxu0 %v1184_v34  ;;  %1429 = vmatpush3.msra.mxu1 %v1201_v38  ;;  %s1575_s25 = scalar_lea.vmem %s1374_s24, 128  ;;  %p1580_p12 = scmp.lt.s32.totalorder %s1374_s24, %s1374_s24 }
 0x112   :  { %1396 = vmatpush3.msra.mxu0 %v1168_v2  ;;  %1430 = vmatprep.subr.mxu1 %v1216_v39  ;;  %v1093_v34 = vmul.u32 2654435761, %v1687_v63  ;;  %v1095_v2 = vmul.u32 2246822519, %v1090_v33  ;;  %p1576_p11 = scmp.ne.s32.totalorder %s1374_s24, %s1575_s25  ;;  %p1581_p13 = scmp.lt.s32.totalorder %s1575_s25, %s1575_s25 }
 0x113   :  { %1397 = vmatprep.subr.mxu0 %v1183_v35  ;;  %1431 = vmatpush3.msra.mxu1 %v1200_v41  ;;  %v1094_v35 = vmul.u32 2246822519, %v1684_v29 }
 0x114   :  { %1398 = vmatpush3.msra.mxu0 %v1167_v17  ;;  %1432 = vmatprep.subr.mxu1 %v1215_v43  ;;  %v1099_v10 = vxor.u32 %v1095_v2, %v1093_v34  ;;  %p1582_p0 = por %p1581_p13, %p1580_p12 }
 0x115   :  { %1399 = vmatprep.subr.mxu0 %v1182_v12  ;;  %1433 = vmatpush3.msra.mxu1 %v1199_v45  ;;  %v1098_v37 = vxor.u32 %v1094_v35, %v1093_v34 }
 0x116   :  { %1400 = vmatpush3.msra.mxu0 %v1166_v40  ;;  %1434 = vmatprep.subr.mxu1 %v1214_v47  ;;  %v1104_v17 = vadd.s32 %v1102_v36, %v1099_v10  ;;  %v1695_v47 = vld [vmem:[#allocation9] sm:$0xf]  ;;  %p1583_p1 = pnand %p1582_p0, %p1576_p11 }
 0x117   :  { %1401 = vmatprep.subr.mxu0 %v1181_v42  ;;  %1435 = vmatpush3.msra.mxu1 %v1198_v49  ;;  %v1103_v38 = vadd.s32 %v1102_v36, %v1098_v37  ;;  %v492_v49 = vsub.s32 1, %v1687_v63 }
 0x118   :  { %1402 = vmatpush3.msra.mxu0 %v1165_v44  ;;  %1436 = vmatprep.subr.mxu1 %v1213_v51  ;;  %v1108_v12 = vshrl.u32 %v1104_v17, 16 }
 0x119   :  { %1403 = vmatprep.subr.mxu0 %v1180_v46  ;;  %1437 = vmatpush3.msra.mxu1 %v1197_v53  ;;  %v1107_v39 = vshrl.u32 %v1103_v38, 16  ;;  %v488_v46 = vsub.s32 0, %v1687_v63 }
 0x11a   :  { %1404 = vmatpush3.msra.mxu0 %v1164_v48  ;;  %1438 = vmatprep.subr.mxu1 %v1212_v55  ;;  %v1112_v40 = vxor.u32 %v1108_v12, %v1104_v17  ;;  %v493_v55 = vrot.slane %v1695_v47, %v492_v49  ;;  %v496_v12 = vsub.s32 2, %v1687_v63 }
 0x11b   :  { %1405 = vmatprep.subr.mxu0 %v1179_v50  ;;  %1439 = vmatpush3.msra.mxu1 %v1196_v57  ;;  %v1111_v41 = vxor.u32 %v1107_v39, %v1103_v38 }
 0x11c   :  { %1406 = vmatpush3.msra.mxu0 %v1163_v52  ;;  %1440 = vmatprep.subr.mxu1 %v1211_v59  ;;  %v1116_v42 = vmul.u32 2146121005, %v1112_v40  ;;  %v489_v52 = vrot.slane %v1695_v47, %v488_v46 }
 0x11d   :  { %1407 = vmatprep.subr.mxu0 %v1178_v54  ;;  %1441 = vmatpush3.msra.mxu1 %v1195_v61  ;;  %v1115_v43 = vmul.u32 2146121005, %v1111_v41 }
 0x11e   :  { %1408 = vmatpush3.msra.mxu0 %v1162_v56  ;;  %1442 = vmatprep.subr.mxu1 %v1210_v14  ;;  %v1120_v44 = vshrl.u32 %v1116_v42, 15 }
 0x11f   :  { %1409 = vmatprep.subr.mxu0 %v1177_v58  ;;  %1443 = vmatpush3.msra.mxu1 %v1194_v15  ;;  %v1119_v45 = vshrl.u32 %v1115_v43, 15 }
 0x120   :  { %1410 = vmatpush3.msra.mxu0 %v1161_v60  ;;  %1444 = vmatprep.subr.mxu1 %v1209_v16  ;;  %v1124_v48 = vxor.u32 %v1120_v44, %v1116_v42 }
 0x121   :  { %1411 = vmatprep.subr.mxu0 %v1176_v62  ;;  %1445 = vmatpush3.msra.mxu1 %v1193_v18  ;;  %v1123_v50 = vxor.u32 %v1119_v45, %v1115_v43 }
 0x122   :  { %1412 = vmatpush3.msra.mxu0 %v1160_v0  ;;  %1446 = vmatprep.subr.mxu1 %v1208_v19  ;;  %v1128_v54 = vmul.u32 2221713035, %v1124_v48 }
 0x123   :  { %1413 = vmatprep.subr.mxu0 %v1175_v1  ;;  %1447 = vmatpush3.msra.mxu1 %v1192_v20  ;;  %v1127_v56 = vmul.u32 2221713035, %v1123_v50 }
 0x124   :  { %1414 = vmatpush3.msra.mxu0 %v1159_v3  ;;  %1448 = vmatprep.subr.mxu1 %v1207_v21  ;;  %v1132_v60 = vshrl.u32 %v1128_v54, 16 }
 0x125   :  { %1415 = vmatprep.subr.mxu0 %v1174_v4  ;;  %1449 = vmatpush3.msra.mxu1 %v1191_v22  ;;  %v1131_v62 = vshrl.u32 %v1127_v56, 16  ;;  %v1092_v22 = vadd.s32 384, %v1684_v29 }
 0x126   :  { %1416 = vmatpush3.msra.mxu0 %v1158_v5  ;;  %1450 = vmatprep.subr.mxu1 %v1206_v23  ;;  %v1136_v4 = vxor.u32 %v1132_v60, %v1128_v54  ;;  %v1091_v23 = vadd.s32 256, %v1684_v29  ;;  %v500_v29 = vsub.s32 3, %v1687_v63 }
 0x127   :  { %1417 = vmatprep.subr.mxu0 %v1173_v6  ;;  %1451 = vmatpush3.msra.mxu1 %v1190_v24  ;;  %v1097_v24 = vmul.u32 2246822519, %v1092_v22 }
 0x128   :  { %1418 = vmatpush3.msra.mxu0 %v1157_v7  ;;  %1452 = vmatprep.subr.mxu1 %v1205_v25  ;;  %v1135_v7 = vxor.u32 %v1131_v62, %v1127_v56  ;;  %v1140_v14 = vand.u32 1, %v1136_v4  ;;  %v1096_v25 = vmul.u32 2246822519, %v1091_v23  ;;  %v501_v43 = vrot.slane %v1695_v47, %v500_v29 }
 0x129   :  { %1419 = vmatprep.subr.mxu0 %v1172_v8  ;;  %1453 = vmatpush3.msra.mxu1 %v1189_v27  ;;  %v1101_v26 = vxor.u32 %v1097_v24, %v1093_v34 }
 0x12a   :  { %1420 = vmatpush3.msra.mxu0 %v1156_v9  ;;  %1454 = vmatprep.subr.mxu1 %v1204_v28  ;;  %v1139_v16 = vand.u32 1, %v1135_v7  ;;  %vm1144_vm1 = vcmp.ne.s32.totalorder %v1140_v14, 0  ;;  %v1100_v27 = vxor.u32 %v1096_v25, %v1093_v34  ;;  %v497_v34 = vrot.slane %v1695_v47, %v496_v12 }
 0x12b   :  { %1421 = vmatprep.subr.mxu0 %v1171_v11  ;;  %1455 = vmatpush3.msra.mxu1 %v1188_v30  ;;  %v1106_v28 = vadd.s32 %v1102_v36, %v1101_v26 }
 0x12c   :  { %1422 = vmatpush3.msra.mxu0 %v1155_v13  ;;  %1456 = vmatprep.subr.mxu1 %v1203_v31  ;;  %vm1143_vm2 = vcmp.ne.s32.totalorder %v1139_v16, 0  ;;  %v1105_v30 = vadd.s32 %v1102_v36, %v1100_v27 }
 0x12d   :  { %1457 = vmatpush3.msra.mxu1 %v1187_v32  ;;  %v1110_v31 = vshrl.u32 %v1106_v28, 16 }
 0x12e   :  { %v1109_v32 = vshrl.u32 %v1105_v30, 16 }
 0x12f   :  { %v1114_v33 = vxor.u32 %v1110_v31, %v1106_v28 }
 0x130   :  { %v1113_v2 = vxor.u32 %v1109_v32, %v1105_v30 }
 0x131   :  { %v1118_v35 = vmul.u32 2146121005, %v1114_v33 }
 0x132   :  { %v1117_v10 = vmul.u32 2146121005, %v1113_v2 }
 0x133   :  { %v1122_v37 = vshrl.u32 %v1118_v35, 15 }
 0x134   :  { %v1121_v17 = vshrl.u32 %v1117_v10, 15 }
 0x135   :  { %v1126_v38 = vxor.u32 %v1122_v37, %v1118_v35 }
 0x136   :  { %v1125_v39 = vxor.u32 %v1121_v17, %v1117_v10 }
 0x137   :  { %v1130_v41 = vmul.u32 2221713035, %v1126_v38 }
 0x138   :  { %v1129_v42 = vmul.u32 2221713035, %v1125_v39 }
 0x139   :  { %v1134_v46 = vshrl.u32 %v1130_v41, 16 }
 0x13a   :  { %v1133_v49 = vshrl.u32 %v1129_v42, 16 }
 0x13b   :  { %v1138_v54 = vxor.u32 %v1134_v46, %v1130_v41 }
 0x13c   :  { %v1137_v56 = vxor.u32 %v1133_v49, %v1129_v42 }
 0x13e   :  { %v1141_v47 = vand.u32 1, %v1137_v56 }
 0x140   :  { %vm1145_vm4 = vcmp.ne.s32.totalorder %v1141_v47, 0 }
 0x142   :  { %v576_v51 = vpop.f32.mrf.mxu0 }
 0x143   :  { %v647_v53 = vpop.f32.mrf.mxu1  ;;  %v577_v58 = vadd.f32 %v576_v51, %v489_v52 }
 0x144   :  { %v578_v57 = vpop.f32.mrf.mxu0 }
 0x145   :  { %v649_v59 = vpop.f32.mrf.mxu1  ;;  %v579_v61 = vadd.f32 %v578_v57, %v493_v55  ;;  %v648_v0 = vadd.f32 %v647_v53, %v577_v58 }
 0x147   :  { %v650_v5 = vadd.f32 %v649_v59, %v579_v61  ;;  %v1142_v61 = vand.u32 1, %v1138_v54 }
 0x148   :  { %v789_v1 = vpop.f32.mrf.mxu1 }
 0x149   :  { %vm1146_vm3 = vcmp.ne.s32.totalorder %v1142_v61, 0 }
 0x14a   :  { %v791_v13 = vpop.f32.mrf.mxu1 }
 0x185   :  { %v718_v3 = vpop.f32.mrf.mxu0 }
 0x186   :  { %v719_v6 = vadd.f32 %v718_v3, %v648_v0 }
 0x187   :  { %v720_v8 = vpop.f32.mrf.mxu0 }
 0x188   :  { %v790_v9 = vadd.f32 %v789_v1, %v719_v6  ;;  %v721_v11 = vadd.f32 %v720_v8, %v650_v5  ;;  %v1386_v8 = vld [vmem:[#allocation12] ss:$0 sm:$0xff] }
 0x18a   :  { %v792_v15 = vadd.f32 %v791_v13, %v721_v11  ;;  %v1078_v18 = vmax.f32 %v790_v9, 0.0  ;;  %v860_v40 = vpop.f32.mrf.mxu1 }
 0x18b   :  { %v861_v48 = vadd.f32 %v860_v40, %v497_v34 }
 0x18c   :  { %v1079_v19 = vmax.f32 %v792_v15, 0.0  ;;  %v1147_v21 = vmul.f32 2.0, %v1078_v18  ;;  %v862_v44 = vpop.f32.mrf.mxu1 }
 0x18d   :  { %v863_v50 = vadd.f32 %v862_v44, %v501_v43 }
 0x18e   :  { %v1148_v20 = vmul.f32 2.0, %v1079_v19 }
 0x190   :  { %1387 = vmatprep.mubr.msk.f32.mxu0 %vm1144_vm1, %v1148_v20 }
 0x191   :  { %1388 = vmatmul.mubr.msk.f32.vlgmr.msra.gmra.mxu0 %vm1143_vm2, %v1147_v21 }
 0x1c7   :  { %v931_v36 = vpop.f32.mrf.mxu0 }
 0x1c8   :  { %v932_v51 = vadd.f32 %v931_v36, %v861_v48 }
 0x1c9   :  { %v933_v45 = vpop.f32.mrf.mxu0 }
 0x1ca   :  { %v934_v55 = vadd.f32 %v933_v45, %v863_v50 }
 0x1cc   :  { %v1002_v52 = vpop.f32.mrf.mxu1 }
 0x1cd   :  { %v1073_v53 = vpop.f32.mrf.mxu0  ;;  %v1003_v63 = vadd.f32 %v1002_v52, %v932_v51 }
 0x1ce   :  { %v1004_v57 = vpop.f32.mrf.mxu1 }
 0x1cf   :  { %v1074_v58 = vadd.f32 %v1073_v53, %v1003_v63  ;;  %v1005_v59 = vadd.f32 %v1004_v57, %v934_v55  ;;  %v1075_v60 = vpop.f32.mrf.mxu0 }
 0x1d1   :  { %v1076_v62 = vadd.f32 %v1075_v60, %v1005_v59  ;;  %v1080_v0 = vmax.f32 %v1074_v58, 0.0 }
 0x1d3   :  { %v1081_v1 = vmax.f32 %v1076_v62, 0.0  ;;  %v1149_v4 = vmul.f32 2.0, %v1080_v0 }
 0x1d5   :  { %v1150_v3 = vmul.f32 2.0, %v1081_v1 }
 0x1d7   :  { %1389 = vmatprep.mubr.msk.f32.mxu1 %vm1146_vm3, %v1150_v3 }
 0x1d8   :  { %1390 = vmatmul.mubr.msk.f32.vlgmr.msra.gmra.mxu1 %vm1145_vm4, %v1149_v4 }
 0x251   :  { %v1423_v5 = vpop.f32.mrf.mxu0 }
 0x253   :  { %v1424_v6 = vpop.f32.mrf.mxu0 }
 0x254   :  { %v1425_v7 = vadd.f32 %v1424_v6, %v1423_v5 }
 0x256   :  { %v1293_v13 = vadd.f32 %v1425_v7, %v1386_v8 }
 0x298   :  { %v1458_v9 = vpop.f32.mrf.mxu1 }
 0x29a   :  { %v1459_v11 = vpop.f32.mrf.mxu1 }
 0x29b   :  { %v1460_v14 = vadd.f32 %v1459_v11, %v1458_v9 }
 0x29d   :  { %v1363_v15 = vadd.f32 %v1460_v14, %v1293_v13 }
 0x29f   :  { %1366 = vst [vmem:[#allocation13] sm:$0xff] %v1363_v15 }
 0x2a0   :  { %1586 = shalt.err (!%p1583_p1)
}
 0x2a1   :  { %1376 = dma.vmem_to_hbm [thread:$0]  %s1374_s24, 128, %s1715_s6, [#allocation6]  }
 0x2a2   :  { %1601 = dma.done.wait [#allocation6], 128  }
 0x2a3   :  { %1602 = vsyncadd [#allocation6], 4294967168 }
 0x2a4   :  { %1380 = vsyncpa [#allocation5], 1 }
 0x2a5   :  { %1381 = vsyncpa [#allocation8], 1 }
 0x2a6   :  { %1382 = vsyncpa [#allocation11], 1 }
 0x2a7   :  { %1383 = vsyncpa [#allocation6], 1 }

</bundles_post_ra>
